<compile_context>
chip_gen: v7x
topology: tpu7x:2x2x1
jax: 0.10.0
libtpu: 0.0.40
codegen_flags: <defaults>
</compile_context>

<pallas_src>
import jax
import jax.numpy as jnp
from jax.experimental import pallas as pl
from jax.experimental.pallas import tpu as pltpu

SEQ_LEN = 50
VOCAB = 2000
EMB_DIM = 32
IN_FEATURES = SEQ_LEN * EMB_DIM          # 1600
HIDDEN = 256
N_CLASSES = 10
C_PAD = 128                              # lane-dense padded class dim
MAX_NORM = 50.0
NEG_BIG = -1e30                          # bias for padded classes -> softmax 0


def mlp_softmax_kernel(x_ref, w1_ref, b1_ref, w2_ref, b2_ref, o_ref):
    # x_ref: (TM, 1600)  w1_ref: (1600, 256)  b1_ref: (1, 256)
    # w2_ref: (256, 128) b2_ref: (1, 128)     o_ref: (TM, 128)
    x = x_ref[...]

    # Linear(1600 -> 256) + ReLU   (MXU matmul, f32 accumulate)
    h = jnp.dot(x, w1_ref[...], preferred_element_type=jnp.float32) + b1_ref[...]
    h = jnp.maximum(h, 0.0)

    # Linear(256 -> 128-padded-classes); padded cols have weight 0, bias -1e30
    logits = jnp.dot(h, w2_ref[...], preferred_element_type=jnp.float32) + b2_ref[...]

    # Softmax over the last axis (padded classes underflow to exactly 0)
    m = jnp.max(logits, axis=-1, keepdims=True)
    e = jnp.exp(logits - m)
    denom = jnp.sum(e, axis=-1, keepdims=True)
    o_ref[...] = (e * pl.reciprocal(denom, approx=False)).astype(o_ref.dtype)


def recruitment1_forward(token_ids, params, tm=256):
    """token_ids: (N, 50) int32.  Returns (N, 10) f32 softmax probabilities."""
    emb, w1, b1, w2, b2 = (params["emb"], params["w1"], params["b1"],
                           params["w2"], params["b2"])
    n = token_ids.shape[0]

    # --- Embedding lookup, then max_norm=50 renorm on the gathered rows only
    gathered = jnp.take(emb, token_ids, axis=0)                  # (N, 50, 32)
    norms = jnp.sqrt(jnp.sum(gathered * gathered, axis=-1, keepdims=True))
    scale = jnp.minimum(1.0, MAX_NORM / jnp.maximum(norms, 1e-12))
    embedded = gathered * scale
    # Dropout(0.2) / Dropout(0.3) -> identity (eval)
    x_flat = embedded.reshape(n, IN_FEATURES)                    # (N, 1600)

    # --- Pad class dim to 128 for a lane-dense output slab / full MXU pass
    w2p = jnp.zeros((HIDDEN, C_PAD), jnp.float32).at[:, :N_CLASSES].set(w2)
    b2p = jnp.full((1, C_PAD), NEG_BIG, jnp.float32).at[:, :N_CLASSES].set(b2)

    # --- Batch tile: multiple of 8 (sublane), capped at `tm` (sized for v7x
    #     VMEM; multiple of 256 when N is large for the 2x256 MXU on v6e/v7x)
    tm_eff = min(tm, max(8, ((n + 7) // 8) * 8))
    n_pad = pl.cdiv(n, tm_eff) * tm_eff
    if n_pad != n:
        x_flat = jnp.pad(x_flat, ((0, n_pad - n), (0, 0)))
    grid = (n_pad // tm_eff,)

    flops = 2 * n_pad * (IN_FEATURES * HIDDEN + HIDDEN * C_PAD)
    transcendentals = n_pad * C_PAD
    bytes_accessed = 4 * (n_pad * IN_FEATURES + IN_FEATURES * HIDDEN + HIDDEN
                          + HIDDEN * C_PAD + C_PAD + n_pad * C_PAD)

    out = pl.pallas_call(
        mlp_softmax_kernel,
        out_shape=jax.ShapeDtypeStruct((n_pad, C_PAD), jnp.float32),
        grid_spec=pltpu.PrefetchScalarGridSpec(
            num_scalar_prefetch=0,
            grid=grid,
            in_specs=[
                pl.BlockSpec((tm_eff, IN_FEATURES), lambda i: (i, 0)),   # x tile
                pl.BlockSpec((IN_FEATURES, HIDDEN), lambda i: (0, 0)),   # w1 resident
                pl.BlockSpec((1, HIDDEN), lambda i: (0, 0)),             # b1 resident
                pl.BlockSpec((HIDDEN, C_PAD), lambda i: (0, 0)),         # w2 resident
                pl.BlockSpec((1, C_PAD), lambda i: (0, 0)),              # b2 resident
            ],
            out_specs=pl.BlockSpec((tm_eff, C_PAD), lambda i: (i, 0)),
        ),
        compiler_params=pltpu.CompilerParams(
            dimension_semantics=("parallel",),
            vmem_limit_bytes=32 * 1024 * 1024,
        ),
        cost_estimate=pl.CostEstimate(
            flops=flops,
            transcendentals=transcendentals,
            bytes_accessed=bytes_accessed,
        ),
    )(x_flat, w1, b1, w2p, b2p)

    return out[:n, :N_CLASSES]


def init_params(key):
    k0, k1, k2, k3, k4 = jax.random.split(key, 5)
    emb = jax.random.normal(k0, (VOCAB, EMB_DIM), jnp.float32)
    # Linear weights stored already-transposed as (in, out): y = x @ W + b
    lim1 = 1.0 / jnp.sqrt(IN_FEATURES)
    w1 = jax.random.uniform(k1, (IN_FEATURES, HIDDEN), jnp.float32, -lim1, lim1)
    b1 = jax.random.uniform(k2, (1, HIDDEN), jnp.float32, -lim1, lim1)
    lim2 = 1.0 / jnp.sqrt(HIDDEN)
    w2 = jax.random.uniform(k3, (HIDDEN, N_CLASSES), jnp.float32, -lim2, lim2)
    b2 = jax.random.uniform(k4, (1, N_CLASSES), jnp.float32, -lim2, lim2)
    return {"emb": emb, "w1": w1, "b1": b1, "w2": w2, "b2": b2}


if __name__ == "__main__":
    key = jax.random.PRNGKey(0)
    pkey, xkey = jax.random.split(key)

    params = init_params(pkey)

    batch = 8
    token_ids = jax.random.randint(xkey, (batch, SEQ_LEN), 0, VOCAB,
                                   dtype=jnp.int32)

    fwd = jax.jit(recruitment1_forward)
    probs = fwd(token_ids, params)
    jax.block_until_ready(probs)

    assert probs.shape == (batch, N_CLASSES)
    # softmax rows sum to 1 (padded class columns contribute exactly 0)
    assert jnp.allclose(jnp.sum(probs, axis=-1), 1.0, atol=1e-5)
    assert bool(jnp.all(probs >= 0.0))

    print("KERNEL_OK")
</pallas_src>

<mosaic_0001>
module attributes {stable_mosaic.version = 11 : i64} {
  func.func @mlp_softmax_kernel(%arg0: i32, %arg1: memref<8x1600xf32, #tpu.memory_space<vmem>>, %arg2: memref<1600x256xf32, #tpu.memory_space<vmem>>, %arg3: memref<1x256xf32, #tpu.memory_space<vmem>>, %arg4: memref<256x128xf32, #tpu.memory_space<vmem>>, %arg5: memref<1x128xf32, #tpu.memory_space<vmem>>, %arg6: memref<8x128xf32, #tpu.memory_space<vmem>>) attributes {dimension_semantics = [#tpu.dimension_semantics<parallel>], iteration_bounds = array<i64: 1>, scalar_prefetch = 0 : i64, scratch_operands = 0 : i64, tpu.core_type = #tpu.core_type<tc>, window_params = [{transform_indices = @transform_0, window_bounds = array<i64: 8, 1600>}, {pipeline_mode = #tpu.pipeline_mode<synchronous>, transform_indices = @transform_1, window_bounds = array<i64: 1600, 256>}, {pipeline_mode = #tpu.pipeline_mode<synchronous>, transform_indices = @transform_2, window_bounds = array<i64: 1, 256>}, {pipeline_mode = #tpu.pipeline_mode<synchronous>, transform_indices = @transform_3, window_bounds = array<i64: 256, 128>}, {pipeline_mode = #tpu.pipeline_mode<synchronous>, transform_indices = @transform_4, window_bounds = array<i64: 1, 128>}, {transform_indices = @transform_5, window_bounds = array<i64: 8, 128>}]} {
    %c0 = arith.constant 0 : index
    %c0_0 = arith.constant 0 : index
    %0 = vector.load %arg1[%c0, %c0_0] : memref<8x1600xf32, #tpu.memory_space<vmem>>, vector<8x1600xf32>
    %c0_1 = arith.constant 0 : index
    %c0_2 = arith.constant 0 : index
    %1 = vector.load %arg2[%c0_1, %c0_2] : memref<1600x256xf32, #tpu.memory_space<vmem>>, vector<1600x256xf32>
    %cst = arith.constant dense<0.000000e+00> : vector<8x256xf32>
    %2 = tpu.matmul %0, %1, %cst {dimension_numbers = #tpu.dot_dimension_numbers<[1], [0], [0], [1], [0, 0, 1, 1], [], []>} : vector<8x1600xf32>, vector<1600x256xf32>, vector<8x256xf32> -> vector<8x256xf32>
    %c0_3 = arith.constant 0 : index
    %c0_4 = arith.constant 0 : index
    %3 = vector.load %arg3[%c0_3, %c0_4] : memref<1x256xf32, #tpu.memory_space<vmem>>, vector<1x256xf32>
    %4 = vector.broadcast %3 : vector<1x256xf32> to vector<8x256xf32>
    %5 = arith.addf %2, %4 : vector<8x256xf32>
    %cst_5 = arith.constant 0.000000e+00 : f32
    %6 = vector.broadcast %cst_5 : f32 to vector<8x256xf32>
    %7 = arith.maximumf %5, %6 : vector<8x256xf32>
    %c0_6 = arith.constant 0 : index
    %c0_7 = arith.constant 0 : index
    %8 = vector.load %arg4[%c0_6, %c0_7] : memref<256x128xf32, #tpu.memory_space<vmem>>, vector<256x128xf32>
    %cst_8 = arith.constant dense<0.000000e+00> : vector<8x128xf32>
    %9 = tpu.matmul %7, %8, %cst_8 {dimension_numbers = #tpu.dot_dimension_numbers<[1], [0], [0], [1], [0, 0, 1, 1], [], []>} : vector<8x256xf32>, vector<256x128xf32>, vector<8x128xf32> -> vector<8x128xf32>
    %c0_9 = arith.constant 0 : index
    %c0_10 = arith.constant 0 : index
    %10 = vector.load %arg5[%c0_9, %c0_10] : memref<1x128xf32, #tpu.memory_space<vmem>>, vector<1x128xf32>
    %11 = vector.broadcast %10 : vector<1x128xf32> to vector<8x128xf32>
    %12 = arith.addf %9, %11 : vector<8x128xf32>
    %cst_11 = arith.constant dense<0xFF800000> : vector<8xf32>
    %13 = vector.multi_reduction <maximumf>, %12, %cst_11 [1] : vector<8x128xf32> to vector<8xf32>
    %14 = vector.shape_cast %13 : vector<8xf32> to vector<8x1xf32>
    %15 = vector.broadcast %14 : vector<8x1xf32> to vector<8x128xf32>
    %16 = arith.subf %12, %15 : vector<8x128xf32>
    %17 = math.exp %16 : vector<8x128xf32>
    %cst_12 = arith.constant dense<0.000000e+00> : vector<8xf32>
    %18 = vector.multi_reduction <add>, %17, %cst_12 [1] : vector<8x128xf32> to vector<8xf32>
    %19 = vector.shape_cast %18 : vector<8xf32> to vector<8x1xf32>
    %20 = tpu.reciprocal %19 : vector<8x1xf32> -> vector<8x1xf32>
    %21 = vector.broadcast %20 : vector<8x1xf32> to vector<8x128xf32>
    %22 = arith.mulf %17, %21 : vector<8x128xf32>
    %c0_13 = arith.constant 0 : index
    %c0_14 = arith.constant 0 : index
    %23 = vector.load %arg6[%c0_13, %c0_14] : memref<8x128xf32, #tpu.memory_space<vmem>>, vector<8x128xf32>
    tpu.vector_store %arg6[%c0_13, %c0_14], %22 {strides = array<i32>} : memref<8x128xf32, #tpu.memory_space<vmem>>, vector<8x128xf32>,
    return
  }
  func.func @transform_0(%arg0: i32) -> (i32, i32) {
    %c0_i32 = arith.constant 0 : i32
    %c0_i32_0 = arith.constant 0 : i32
    return %arg0, %c0_i32 : i32, i32
  }
  func.func @transform_1(%arg0: i32) -> (i32, i32) {
    %c0_i32 = arith.constant 0 : i32
    %c0_i32_0 = arith.constant 0 : i32
    %c0_i32_1 = arith.constant 0 : i32
    return %c0_i32, %c0_i32_0 : i32, i32
  }
  func.func @transform_2(%arg0: i32) -> (i32, i32) {
    %c0_i32 = arith.constant 0 : i32
    %c0_i32_0 = arith.constant 0 : i32
    %c0_i32_1 = arith.constant 0 : i32
    return %c0_i32, %c0_i32_0 : i32, i32
  }
  func.func @transform_3(%arg0: i32) -> (i32, i32) {
    %c0_i32 = arith.constant 0 : i32
    %c0_i32_0 = arith.constant 0 : i32
    %c0_i32_1 = arith.constant 0 : i32
    return %c0_i32, %c0_i32_0 : i32, i32
  }
  func.func @transform_4(%arg0: i32) -> (i32, i32) {
    %c0_i32 = arith.constant 0 : i32
    %c0_i32_0 = arith.constant 0 : i32
    %c0_i32_1 = arith.constant 0 : i32
    return %c0_i32, %c0_i32_0 : i32, i32
  }
  func.func @transform_5(%arg0: i32) -> (i32, i32) {
    %c0_i32 = arith.constant 0 : i32
    %c0_i32_0 = arith.constant 0 : i32
    return %arg0, %c0_i32 : i32, i32
  }
}

</mosaic_0001>

<bundles_post_ra>
// kernel: recruitment1_forward.1
= control target key start
LH: loop header
LB: loop body
LE: loop exit
PB: predicated region body
PF: predicated region fallthrough
CT: control target
= control target key end

     0   :  { %s2980_s0 = inlined_call_operand.vmem [shape: f32[8,1600], index: 0, kind: input, shape index: {}]   ;;  %s2981_s1 = inlined_call_operand.vmem [shape: f32[1600,256], index: 1, kind: input, shape index: {}]   ;;  %s2982_s2 = inlined_call_operand.vmem [shape: f32[1,256], index: 2, kind: input, shape index: {}]   ;;  %s2983_s3 = inlined_call_operand.vmem [shape: f32[256,128], index: 3, kind: input, shape index: {}]   ;;  %s2984_s4 = inlined_call_operand.vmem [shape: f32[1,128], index: 4, kind: input, shape index: {}]   ;;  %s2985_s5 = inlined_call_operand.hbm [shape: f32[8,128], index: 5, kind: output, shape index: {}]  }
   0x1   :  { %v35_v0 = vld [vmem:[%s2981_s1 + $0x8] sm:$0xff]  ;;  %v37_v1 = vld [vmem:[%s2981_s1 + $0x18] sm:$0xff]  ;;  %v34_v5 = vld [vmem:[%s2981_s1] sm:$0xff] }
   0x2   :  { %v227_v2 = vld [vmem:[%s2981_s1 + $0x608] sm:$0xff]  ;;  %v1119_v3 = vpack.c.bf16 %v37_v1, %v35_v0  ;;  %v229_v4 = vld [vmem:[%s2981_s1 + $0x618] sm:$0xff]  ;;  %v36_v6 = vld [vmem:[%s2981_s1 + $0x10] sm:$0xff] }
   0x3   :  { %v1311_v7 = vpack.c.bf16 %v229_v4, %v227_v2  ;;  %v1121_v8 = vpack.c.bf16 %v36_v6, %v34_v5  ;;  %v226_v9 = vld [vmem:[%s2981_s1 + $0x600] sm:$0xff]  ;;  %v228_v10 = vld [vmem:[%s2981_s1 + $0x610] sm:$0xff]  ;;  %v39_v11 = vld [vmem:[%s2981_s1 + $0x28] sm:$0xff] }
   0x4   :  { %1120 = vmatprep.subr.bf16.mxu1 %v1119_v3  ;;  %v1313_v12 = vpack.c.bf16 %v228_v10, %v226_v9  ;;  %v41_v13 = vld [vmem:[%s2981_s1 + $0x38] sm:$0xff]  ;;  %v231_v14 = vld [vmem:[%s2981_s1 + $0x628] sm:$0xff]  ;;  %v38_v18 = vld [vmem:[%s2981_s1 + $0x20] sm:$0xff] }
   0x5   :  { %v233_v15 = vld [vmem:[%s2981_s1 + $0x638] sm:$0xff]  ;;  %1312 = vmatprep.subr.bf16.mxu0 %v1311_v7  ;;  %1122 = vmatpush1.bf16.msra.mxu1 %v1121_v8  ;;  %v1123_v16 = vpack.c.bf16 %v41_v13, %v39_v11  ;;  %v40_v19 = vld [vmem:[%s2981_s1 + $0x30] sm:$0xff]  ;;  %v230_v20 = vld [vmem:[%s2981_s1 + $0x620] sm:$0xff] }
   0x6   :  { %v1315_v17 = vpack.c.bf16 %v233_v15, %v231_v14  ;;  %1314 = vmatpush1.bf16.msra.mxu0 %v1313_v12  ;;  %v1125_v21 = vpack.c.bf16 %v40_v19, %v38_v18  ;;  %v232_v22 = vld [vmem:[%s2981_s1 + $0x630] sm:$0xff]  ;;  %v43_v23 = vld [vmem:[%s2981_s1 + $0x48] sm:$0xff]  ;;  %v45_v24 = vld [vmem:[%s2981_s1 + $0x58] sm:$0xff] }
   0x7   :  { %1124 = vmatprep.subr.bf16.mxu1 %v1123_v16  ;;  %v1317_v25 = vpack.c.bf16 %v232_v22, %v230_v20  ;;  %v1127_v26 = vpack.c.bf16 %v45_v24, %v43_v23  ;;  %v235_v27 = vld [vmem:[%s2981_s1 + $0x648] sm:$0xff]  ;;  %v237_v28 = vld [vmem:[%s2981_s1 + $0x658] sm:$0xff]  ;;  %v42_v29 = vld [vmem:[%s2981_s1 + $0x40] sm:$0xff] }
   0x8   :  { %1316 = vmatprep.subr.bf16.mxu0 %v1315_v17  ;;  %v1319_v30 = vpack.c.bf16 %v237_v28, %v235_v27  ;;  %v44_v31 = vld [vmem:[%s2981_s1 + $0x50] sm:$0xff]  ;;  %v234_v32 = vld [vmem:[%s2981_s1 + $0x640] sm:$0xff]  ;;  %v47_v35 = vld [vmem:[%s2981_s1 + $0x68] sm:$0xff] }
   0x9   :  { %v236_v33 = vld [vmem:[%s2981_s1 + $0x650] sm:$0xff]  ;;  %1126 = vmatpush1.bf16.msra.mxu1 %v1125_v21  ;;  %v1129_v34 = vpack.c.bf16 %v44_v31, %v42_v29  ;;  %v49_v36 = vld [vmem:[%s2981_s1 + $0x78] sm:$0xff]  ;;  %v239_v37 = vld [vmem:[%s2981_s1 + $0x668] sm:$0xff] }
   0xa   :  { %1318 = vmatpush1.bf16.msra.mxu0 %v1317_v25  ;;  %1128 = vmatprep.subr.bf16.mxu1 %v1127_v26  ;;  %v1321_v38 = vpack.c.bf16 %v236_v33, %v234_v32  ;;  %v1131_v39 = vpack.c.bf16 %v49_v36, %v47_v35  ;;  %v241_v40 = vld [vmem:[%s2981_s1 + $0x678] sm:$0xff]  ;;  %v46_v41 = vld [vmem:[%s2981_s1 + $0x60] sm:$0xff]  ;;  %v48_v42 = vld [vmem:[%s2981_s1 + $0x70] sm:$0xff] }
   0xb   :  { %1320 = vmatprep.subr.bf16.mxu0 %v1319_v30  ;;  %v1323_v43 = vpack.c.bf16 %v241_v40, %v239_v37  ;;  %v238_v44 = vld [vmem:[%s2981_s1 + $0x660] sm:$0xff]  ;;  %v240_v45 = vld [vmem:[%s2981_s1 + $0x670] sm:$0xff]  ;;  %v51_v46 = vld [vmem:[%s2981_s1 + $0x88] sm:$0xff]  ;;  %v1133_v50 = vpack.c.bf16 %v48_v42, %v46_v41 }
   0xc   :  { %v53_v47 = vld [vmem:[%s2981_s1 + $0x98] sm:$0xff]  ;;  %v243_v48 = vld [vmem:[%s2981_s1 + $0x688] sm:$0xff]  ;;  %v1325_v51 = vpack.c.bf16 %v240_v45, %v238_v44  ;;  %v50_v53 = vld [vmem:[%s2981_s1 + $0x80] sm:$0xff] }
   0xd   :  { %v245_v49 = vld [vmem:[%s2981_s1 + $0x698] sm:$0xff]  ;;  %1130 = vmatpush1.bf16.msra.mxu1 %v1129_v34  ;;  %v1135_v52 = vpack.c.bf16 %v53_v47, %v51_v46  ;;  %v52_v54 = vld [vmem:[%s2981_s1 + $0x90] sm:$0xff]  ;;  %v242_v55 = vld [vmem:[%s2981_s1 + $0x680] sm:$0xff] }
   0xe   :  { %1322 = vmatpush1.bf16.msra.mxu0 %v1321_v38  ;;  %1132 = vmatprep.subr.bf16.mxu1 %v1131_v39  ;;  %v1327_v56 = vpack.c.bf16 %v245_v49, %v243_v48  ;;  %v244_v57 = vld [vmem:[%s2981_s1 + $0x690] sm:$0xff]  ;;  %v55_v58 = vld [vmem:[%s2981_s1 + $0xa8] sm:$0xff]  ;;  %v57_v59 = vld [vmem:[%s2981_s1 + $0xb8] sm:$0xff]  ;;  %v1137_v62 = vpack.c.bf16 %v52_v54, %v50_v53 }
   0xf   :  { %1324 = vmatprep.subr.bf16.mxu0 %v1323_v43  ;;  %v247_v60 = vld [vmem:[%s2981_s1 + $0x6a8] sm:$0xff]  ;;  %v249_v61 = vld [vmem:[%s2981_s1 + $0x6b8] sm:$0xff]  ;;  %v1329_v63 = vpack.c.bf16 %v244_v57, %v242_v55  ;;  %v1139_v0 = vpack.c.bf16 %v57_v59, %v55_v58  ;;  %v54_v1 = vld [vmem:[%s2981_s1 + $0xa0] sm:$0xff] }
  0x10   :  { %v56_v2 = vld [vmem:[%s2981_s1 + $0xb0] sm:$0xff]  ;;  %v246_v3 = vld [vmem:[%s2981_s1 + $0x6a0] sm:$0xff]  ;;  %v1331_v4 = vpack.c.bf16 %v249_v61, %v247_v60  ;;  %v59_v6 = vld [vmem:[%s2981_s1 + $0xc8] sm:$0xff] }
  0x11   :  { %1134 = vmatpush1.bf16.msra.mxu1 %v1133_v50  ;;  %v248_v5 = vld [vmem:[%s2981_s1 + $0x6b0] sm:$0xff]  ;;  %v61_v7 = vld [vmem:[%s2981_s1 + $0xd8] sm:$0xff]  ;;  %v251_v8 = vld [vmem:[%s2981_s1 + $0x6c8] sm:$0xff]  ;;  %v1141_v10 = vpack.c.bf16 %v56_v2, %v54_v1 }
  0x12   :  { %1326 = vmatpush1.bf16.msra.mxu0 %v1325_v51  ;;  %1136 = vmatprep.subr.bf16.mxu1 %v1135_v52  ;;  %v253_v9 = vld [vmem:[%s2981_s1 + $0x6d8] sm:$0xff]  ;;  %v1333_v11 = vpack.c.bf16 %v248_v5, %v246_v3  ;;  %v1143_v12 = vpack.c.bf16 %v61_v7, %v59_v6  ;;  %v58_v13 = vld [vmem:[%s2981_s1 + $0xc0] sm:$0xff]  ;;  %v60_v14 = vld [vmem:[%s2981_s1 + $0xd0] sm:$0xff] }
  0x13   :  { %1328 = vmatprep.subr.bf16.mxu0 %v1327_v56  ;;  %v250_v15 = vld [vmem:[%s2981_s1 + $0x6c0] sm:$0xff]  ;;  %v1335_v16 = vpack.c.bf16 %v253_v9, %v251_v8  ;;  %v252_v17 = vld [vmem:[%s2981_s1 + $0x6d0] sm:$0xff]  ;;  %v63_v18 = vld [vmem:[%s2981_s1 + $0xe8] sm:$0xff]  ;;  %v1145_v22 = vpack.c.bf16 %v60_v14, %v58_v13 }
  0x14   :  { %v65_v19 = vld [vmem:[%s2981_s1 + $0xf8] sm:$0xff]  ;;  %v255_v20 = vld [vmem:[%s2981_s1 + $0x6e8] sm:$0xff]  ;;  %v1337_v23 = vpack.c.bf16 %v252_v17, %v250_v15  ;;  %v62_v25 = vld [vmem:[%s2981_s1 + $0xe0] sm:$0xff] }
  0x15   :  { %1138 = vmatpush1.bf16.msra.mxu1 %v1137_v62  ;;  %v257_v21 = vld [vmem:[%s2981_s1 + $0x6f8] sm:$0xff]  ;;  %v1147_v24 = vpack.c.bf16 %v65_v19, %v63_v18  ;;  %v64_v26 = vld [vmem:[%s2981_s1 + $0xf0] sm:$0xff]  ;;  %v254_v27 = vld [vmem:[%s2981_s1 + $0x6e0] sm:$0xff] }
  0x16   :  { %1330 = vmatpush1.bf16.msra.mxu0 %v1329_v63  ;;  %1140 = vmatprep.subr.bf16.mxu1 %v1139_v0  ;;  %v1339_v28 = vpack.c.bf16 %v257_v21, %v255_v20  ;;  %v256_v29 = vld [vmem:[%s2981_s1 + $0x6f0] sm:$0xff]  ;;  %v67_v30 = vld [vmem:[%s2981_s1 + $0x108] sm:$0xff]  ;;  %v69_v31 = vld [vmem:[%s2981_s1 + $0x118] sm:$0xff]  ;;  %v1149_v34 = vpack.c.bf16 %v64_v26, %v62_v25 }
  0x17   :  { %1332 = vmatprep.subr.bf16.mxu0 %v1331_v4  ;;  %v259_v32 = vld [vmem:[%s2981_s1 + $0x708] sm:$0xff]  ;;  %v261_v33 = vld [vmem:[%s2981_s1 + $0x718] sm:$0xff]  ;;  %v1341_v35 = vpack.c.bf16 %v256_v29, %v254_v27  ;;  %v1151_v36 = vpack.c.bf16 %v69_v31, %v67_v30  ;;  %v66_v37 = vld [vmem:[%s2981_s1 + $0x100] sm:$0xff] }
  0x18   :  { %v68_v38 = vld [vmem:[%s2981_s1 + $0x110] sm:$0xff]  ;;  %v258_v39 = vld [vmem:[%s2981_s1 + $0x700] sm:$0xff]  ;;  %v1343_v40 = vpack.c.bf16 %v261_v33, %v259_v32  ;;  %v71_v42 = vld [vmem:[%s2981_s1 + $0x128] sm:$0xff] }
  0x19   :  { %1142 = vmatpush1.bf16.msra.mxu1 %v1141_v10  ;;  %v260_v41 = vld [vmem:[%s2981_s1 + $0x710] sm:$0xff]  ;;  %v73_v43 = vld [vmem:[%s2981_s1 + $0x138] sm:$0xff]  ;;  %v263_v44 = vld [vmem:[%s2981_s1 + $0x728] sm:$0xff]  ;;  %v1153_v46 = vpack.c.bf16 %v68_v38, %v66_v37 }
  0x1a   :  { %1334 = vmatpush1.bf16.msra.mxu0 %v1333_v11  ;;  %1144 = vmatprep.subr.bf16.mxu1 %v1143_v12  ;;  %v265_v45 = vld [vmem:[%s2981_s1 + $0x738] sm:$0xff]  ;;  %v1345_v47 = vpack.c.bf16 %v260_v41, %v258_v39  ;;  %v1155_v48 = vpack.c.bf16 %v73_v43, %v71_v42  ;;  %v70_v49 = vld [vmem:[%s2981_s1 + $0x120] sm:$0xff]  ;;  %v72_v50 = vld [vmem:[%s2981_s1 + $0x130] sm:$0xff] }
  0x1b   :  { %1336 = vmatprep.subr.bf16.mxu0 %v1335_v16  ;;  %v262_v51 = vld [vmem:[%s2981_s1 + $0x720] sm:$0xff]  ;;  %v1347_v52 = vpack.c.bf16 %v265_v45, %v263_v44  ;;  %v264_v53 = vld [vmem:[%s2981_s1 + $0x730] sm:$0xff]  ;;  %v75_v54 = vld [vmem:[%s2981_s1 + $0x148] sm:$0xff]  ;;  %v1157_v58 = vpack.c.bf16 %v72_v50, %v70_v49 }
  0x1c   :  { %v77_v55 = vld [vmem:[%s2981_s1 + $0x158] sm:$0xff]  ;;  %v267_v56 = vld [vmem:[%s2981_s1 + $0x748] sm:$0xff]  ;;  %v1349_v59 = vpack.c.bf16 %v264_v53, %v262_v51  ;;  %v74_v61 = vld [vmem:[%s2981_s1 + $0x140] sm:$0xff] }
  0x1d   :  { %1146 = vmatpush1.bf16.msra.mxu1 %v1145_v22  ;;  %v269_v57 = vld [vmem:[%s2981_s1 + $0x758] sm:$0xff]  ;;  %v1159_v60 = vpack.c.bf16 %v77_v55, %v75_v54  ;;  %v76_v62 = vld [vmem:[%s2981_s1 + $0x150] sm:$0xff]  ;;  %v266_v63 = vld [vmem:[%s2981_s1 + $0x740] sm:$0xff] }
  0x1e   :  { %1338 = vmatpush1.bf16.msra.mxu0 %v1337_v23  ;;  %1148 = vmatprep.subr.bf16.mxu1 %v1147_v24  ;;  %v1351_v0 = vpack.c.bf16 %v269_v57, %v267_v56  ;;  %v268_v1 = vld [vmem:[%s2981_s1 + $0x750] sm:$0xff]  ;;  %v79_v2 = vld [vmem:[%s2981_s1 + $0x168] sm:$0xff]  ;;  %v81_v3 = vld [vmem:[%s2981_s1 + $0x178] sm:$0xff]  ;;  %v1161_v6 = vpack.c.bf16 %v76_v62, %v74_v61 }
  0x1f   :  { %1340 = vmatprep.subr.bf16.mxu0 %v1339_v28  ;;  %v271_v4 = vld [vmem:[%s2981_s1 + $0x768] sm:$0xff]  ;;  %v273_v5 = vld [vmem:[%s2981_s1 + $0x778] sm:$0xff]  ;;  %v78_v7 = vld [vmem:[%s2981_s1 + $0x160] sm:$0xff]  ;;  %v1353_v8 = vpack.c.bf16 %v268_v1, %v266_v63  ;;  %v1163_v9 = vpack.c.bf16 %v81_v3, %v79_v2 }
  0x20   :  { %v80_v10 = vld [vmem:[%s2981_s1 + $0x170] sm:$0xff]  ;;  %v270_v11 = vld [vmem:[%s2981_s1 + $0x760] sm:$0xff]  ;;  %v1355_v13 = vpack.c.bf16 %v273_v5, %v271_v4  ;;  %v83_v14 = vld [vmem:[%s2981_s1 + $0x188] sm:$0xff] }
  0x21   :  { %1150 = vmatpush1.bf16.msra.mxu1 %v1149_v34  ;;  %v272_v12 = vld [vmem:[%s2981_s1 + $0x770] sm:$0xff]  ;;  %v85_v15 = vld [vmem:[%s2981_s1 + $0x198] sm:$0xff]  ;;  %v22_v16 = vld [vmem:[%s2980_s0 + $0x8] sm:$0xff]  ;;  %v1165_v20 = vpack.c.bf16 %v80_v10, %v78_v7 }
  0x22   :  { %1342 = vmatpush1.bf16.msra.mxu0 %v1341_v35  ;;  %1152 = vmatprep.subr.bf16.mxu1 %v1151_v36  ;;  %v275_v17 = vld [vmem:[%s2981_s1 + $0x788] sm:$0xff]  ;;  %v277_v18 = vld [vmem:[%s2981_s1 + $0x798] sm:$0xff]  ;;  %v1357_v21 = vpack.c.bf16 %v272_v12, %v270_v11  ;;  %v1167_v22 = vpack.c.bf16 %v85_v15, %v83_v14  ;;  %v82_v23 = vld [vmem:[%s2981_s1 + $0x180] sm:$0xff] }
  0x23   :  { %1344 = vmatprep.subr.bf16.mxu0 %v1343_v40  ;;  %514 = vmatprep.mubr.f32.mxu1 %v22_v16  ;;  %v28_v19 = vld [vmem:[%s2980_s0 + $0x38] sm:$0xff]  ;;  %v84_v24 = vld [vmem:[%s2981_s1 + $0x190] sm:$0xff]  ;;  %v274_v25 = vld [vmem:[%s2981_s1 + $0x780] sm:$0xff]  ;;  %v1359_v26 = vpack.c.bf16 %v277_v18, %v275_v17 }
  0x24   :  { %727 = vmatprep.mubr.f32.mxu0 %v28_v19  ;;  %v276_v27 = vld [vmem:[%s2981_s1 + $0x790] sm:$0xff]  ;;  %v87_v28 = vld [vmem:[%s2981_s1 + $0x1a8] sm:$0xff]  ;;  %v89_v29 = vld [vmem:[%s2981_s1 + $0x1b8] sm:$0xff]  ;;  %v1169_v32 = vpack.c.bf16 %v84_v24, %v82_v23 }
  0x25   :  { %1154 = vmatpush1.bf16.msra.mxu1 %v1153_v46  ;;  %v279_v30 = vld [vmem:[%s2981_s1 + $0x7a8] sm:$0xff]  ;;  %v281_v31 = vld [vmem:[%s2981_s1 + $0x7b8] sm:$0xff]  ;;  %v1361_v33 = vpack.c.bf16 %v276_v27, %v274_v25  ;;  %v1171_v34 = vpack.c.bf16 %v89_v29, %v87_v28  ;;  %v86_v35 = vld [vmem:[%s2981_s1 + $0x1a0] sm:$0xff] }
  0x26   :  { %1346 = vmatpush1.bf16.msra.mxu0 %v1345_v47  ;;  %1156 = vmatprep.subr.bf16.mxu1 %v1155_v48  ;;  %v88_v36 = vld [vmem:[%s2981_s1 + $0x1b0] sm:$0xff]  ;;  %v278_v37 = vld [vmem:[%s2981_s1 + $0x7a0] sm:$0xff]  ;;  %v1363_v38 = vpack.c.bf16 %v281_v31, %v279_v30  ;;  %v91_v40 = vld [vmem:[%s2981_s1 + $0x1c8] sm:$0xff] }
  0x27   :  { %1348 = vmatprep.subr.bf16.mxu0 %v1347_v52  ;;  %v280_v39 = vld [vmem:[%s2981_s1 + $0x7b0] sm:$0xff]  ;;  %v93_v41 = vld [vmem:[%s2981_s1 + $0x1d8] sm:$0xff]  ;;  %v283_v42 = vld [vmem:[%s2981_s1 + $0x7c8] sm:$0xff]  ;;  %v1173_v44 = vpack.c.bf16 %v88_v36, %v86_v35 }
  0x28   :  { %v285_v43 = vld [vmem:[%s2981_s1 + $0x7d8] sm:$0xff]  ;;  %v1365_v45 = vpack.c.bf16 %v280_v39, %v278_v37  ;;  %v1175_v46 = vpack.c.bf16 %v93_v41, %v91_v40  ;;  %v90_v47 = vld [vmem:[%s2981_s1 + $0x1c0] sm:$0xff]  ;;  %v92_v48 = vld [vmem:[%s2981_s1 + $0x1d0] sm:$0xff] }
  0x29   :  { %1158 = vmatpush1.bf16.msra.mxu1 %v1157_v58  ;;  %v282_v49 = vld [vmem:[%s2981_s1 + $0x7c0] sm:$0xff]  ;;  %v1367_v50 = vpack.c.bf16 %v285_v43, %v283_v42  ;;  %v284_v51 = vld [vmem:[%s2981_s1 + $0x7d0] sm:$0xff]  ;;  %v95_v52 = vld [vmem:[%s2981_s1 + $0x1e8] sm:$0xff]  ;;  %v1177_v56 = vpack.c.bf16 %v92_v48, %v90_v47 }
  0x2a   :  { %1350 = vmatpush1.bf16.msra.mxu0 %v1349_v59  ;;  %1160 = vmatprep.subr.bf16.mxu1 %v1159_v60  ;;  %v97_v53 = vld [vmem:[%s2981_s1 + $0x1f8] sm:$0xff]  ;;  %v287_v54 = vld [vmem:[%s2981_s1 + $0x7e8] sm:$0xff]  ;;  %v1369_v57 = vpack.c.bf16 %v284_v51, %v282_v49  ;;  %v94_v59 = vld [vmem:[%s2981_s1 + $0x1e0] sm:$0xff] }
  0x2b   :  { %1352 = vmatprep.subr.bf16.mxu0 %v1351_v0  ;;  %v289_v55 = vld [vmem:[%s2981_s1 + $0x7f8] sm:$0xff]  ;;  %v1179_v58 = vpack.c.bf16 %v97_v53, %v95_v52  ;;  %v96_v60 = vld [vmem:[%s2981_s1 + $0x1f0] sm:$0xff]  ;;  %v286_v61 = vld [vmem:[%s2981_s1 + $0x7e0] sm:$0xff] }
  0x2c   :  { %v1371_v62 = vpack.c.bf16 %v289_v55, %v287_v54  ;;  %v288_v63 = vld [vmem:[%s2981_s1 + $0x7f0] sm:$0xff]  ;;  %v99_v0 = vld [vmem:[%s2981_s1 + $0x208] sm:$0xff]  ;;  %v101_v1 = vld [vmem:[%s2981_s1 + $0x218] sm:$0xff]  ;;  %v1181_v4 = vpack.c.bf16 %v96_v60, %v94_v59 }
  0x2d   :  { %1162 = vmatpush1.bf16.msra.mxu1 %v1161_v6  ;;  %v291_v2 = vld [vmem:[%s2981_s1 + $0x808] sm:$0xff]  ;;  %v293_v3 = vld [vmem:[%s2981_s1 + $0x818] sm:$0xff]  ;;  %v1373_v5 = vpack.c.bf16 %v288_v63, %v286_v61  ;;  %v1183_v6 = vpack.c.bf16 %v101_v1, %v99_v0  ;;  %v98_v7 = vld [vmem:[%s2981_s1 + $0x200] sm:$0xff] }
  0x2e   :  { %1354 = vmatpush1.bf16.msra.mxu0 %v1353_v8  ;;  %1164 = vmatprep.subr.bf16.mxu1 %v1163_v9  ;;  %v100_v8 = vld [vmem:[%s2981_s1 + $0x210] sm:$0xff]  ;;  %v290_v9 = vld [vmem:[%s2981_s1 + $0x800] sm:$0xff]  ;;  %v1375_v10 = vpack.c.bf16 %v293_v3, %v291_v2  ;;  %v103_v12 = vld [vmem:[%s2981_s1 + $0x228] sm:$0xff] }
  0x2f   :  { %1356 = vmatprep.subr.bf16.mxu0 %v1355_v13  ;;  %v292_v11 = vld [vmem:[%s2981_s1 + $0x810] sm:$0xff]  ;;  %v105_v13 = vld [vmem:[%s2981_s1 + $0x238] sm:$0xff]  ;;  %v295_v14 = vld [vmem:[%s2981_s1 + $0x828] sm:$0xff]  ;;  %v1185_v17 = vpack.c.bf16 %v100_v8, %v98_v7 }
  0x30   :  { %v297_v15 = vld [vmem:[%s2981_s1 + $0x838] sm:$0xff]  ;;  %v21_v16 = vld [vmem:[%s2980_s0] sm:$0xff]  ;;  %v27_v18 = vld [vmem:[%s2980_s0 + $0x30] sm:$0xff]  ;;  %v1377_v19 = vpack.c.bf16 %v292_v11, %v290_v9 }
  0x31   :  { %1166 = vmatpush1.bf16.msra.mxu1 %v1165_v20  ;;  %v1187_v20 = vpack.c.bf16 %v105_v13, %v103_v12  ;;  %v294_v23 = vld [vmem:[%s2981_s1 + $0x820] sm:$0xff]  ;;  %v1379_v24 = vpack.c.bf16 %v297_v15, %v295_v14  ;;  %v296_v25 = vld [vmem:[%s2981_s1 + $0x830] sm:$0xff]  ;;  %v109_v27 = vld [vmem:[%s2981_s1 + $0x258] sm:$0xff] }
  0x32   :  { %1358 = vmatpush1.bf16.msra.mxu0 %v1357_v21  ;;  %1168 = vmatprep.subr.bf16.mxu1 %v1167_v22  ;;  %v102_v21 = vld [vmem:[%s2981_s1 + $0x220] sm:$0xff]  ;;  %v104_v22 = vld [vmem:[%s2981_s1 + $0x230] sm:$0xff]  ;;  %v299_v28 = vld [vmem:[%s2981_s1 + $0x848] sm:$0xff]  ;;  %v1381_v31 = vpack.c.bf16 %v296_v25, %v294_v23 }
  0x33   :  { %1360 = vmatprep.subr.bf16.mxu0 %v1359_v26  ;;  %v107_v26 = vld [vmem:[%s2981_s1 + $0x248] sm:$0xff]  ;;  %v301_v29 = vld [vmem:[%s2981_s1 + $0x858] sm:$0xff]  ;;  %v1189_v30 = vpack.c.bf16 %v104_v22, %v102_v21  ;;  %v298_v35 = vld [vmem:[%s2981_s1 + $0x840] sm:$0xff] }
  0x34   :  { %v1383_v36 = vpack.c.bf16 %v301_v29, %v299_v28  ;;  %v300_v37 = vld [vmem:[%s2981_s1 + $0x850] sm:$0xff]  ;;  %v113_v39 = vld [vmem:[%s2981_s1 + $0x278] sm:$0xff]  ;;  %v303_v40 = vld [vmem:[%s2981_s1 + $0x868] sm:$0xff] }
  0x35   :  { %1170 = vmatpush1.bf16.msra.mxu1 %v1169_v32  ;;  %v1191_v32 = vpack.c.bf16 %v109_v27, %v107_v26  ;;  %v305_v41 = vld [vmem:[%s2981_s1 + $0x878] sm:$0xff]  ;;  %v1385_v43 = vpack.c.bf16 %v300_v37, %v298_v35  ;;  %v302_v47 = vld [vmem:[%s2981_s1 + $0x860] sm:$0xff]  ;;  %v304_v49 = vld [vmem:[%s2981_s1 + $0x870] sm:$0xff] }
  0x36   :  { %1362 = vmatpush1.bf16.msra.mxu0 %v1361_v33  ;;  %1172 = vmatprep.subr.bf16.mxu1 %v1171_v34  ;;  %v106_v33 = vld [vmem:[%s2981_s1 + $0x240] sm:$0xff]  ;;  %v108_v34 = vld [vmem:[%s2981_s1 + $0x250] sm:$0xff]  ;;  %v1387_v48 = vpack.c.bf16 %v305_v41, %v303_v40  ;;  %v117_v51 = vld [vmem:[%s2981_s1 + $0x298] sm:$0xff]  ;;  %v1389_v55 = vpack.c.bf16 %v304_v49, %v302_v47 }
  0x37   :  { %1364 = vmatprep.subr.bf16.mxu0 %v1363_v38  ;;  %v111_v38 = vld [vmem:[%s2981_s1 + $0x268] sm:$0xff]  ;;  %v1193_v42 = vpack.c.bf16 %v108_v34, %v106_v33  ;;  %v309_v53 = vld [vmem:[%s2981_s1 + $0x898] sm:$0xff]  ;;  %v306_v59 = vld [vmem:[%s2981_s1 + $0x880] sm:$0xff] }
  0x38   :  { %v307_v52 = vld [vmem:[%s2981_s1 + $0x888] sm:$0xff]  ;;  %v308_v61 = vld [vmem:[%s2981_s1 + $0x890] sm:$0xff]  ;;  %v121_v63 = vld [vmem:[%s2981_s1 + $0x2b8] sm:$0xff] }
  0x39   :  { %1174 = vmatpush1.bf16.msra.mxu1 %v1173_v44  ;;  %v1195_v44 = vpack.c.bf16 %v113_v39, %v111_v38  ;;  %v1391_v60 = vpack.c.bf16 %v309_v53, %v307_v52  ;;  %v311_v0 = vld [vmem:[%s2981_s1 + $0x8a8] sm:$0xff]  ;;  %v313_v1 = vld [vmem:[%s2981_s1 + $0x8b8] sm:$0xff]  ;;  %v1393_v3 = vpack.c.bf16 %v308_v61, %v306_v59  ;;  %v310_v7 = vld [vmem:[%s2981_s1 + $0x8a0] sm:$0xff] }
  0x3a   :  { %1366 = vmatpush1.bf16.msra.mxu0 %v1365_v45  ;;  %1176 = vmatprep.subr.bf16.mxu1 %v1175_v46  ;;  %v110_v45 = vld [vmem:[%s2981_s1 + $0x260] sm:$0xff]  ;;  %v112_v46 = vld [vmem:[%s2981_s1 + $0x270] sm:$0xff]  ;;  %v1395_v8 = vpack.c.bf16 %v313_v1, %v311_v0  ;;  %v125_v11 = vld [vmem:[%s2981_s1 + $0x2d8] sm:$0xff] }
  0x3b   :  { %1368 = vmatprep.subr.bf16.mxu0 %v1367_v50  ;;  %v115_v50 = vld [vmem:[%s2981_s1 + $0x288] sm:$0xff]  ;;  %v1197_v54 = vpack.c.bf16 %v112_v46, %v110_v45  ;;  %v312_v9 = vld [vmem:[%s2981_s1 + $0x8b0] sm:$0xff]  ;;  %v317_v13 = vld [vmem:[%s2981_s1 + $0x8d8] sm:$0xff] }
  0x3c   :  { %v315_v12 = vld [vmem:[%s2981_s1 + $0x8c8] sm:$0xff]  ;;  %v122_v15 = vld [vmem:[%s2981_s1 + $0x2c0] sm:$0xff]  ;;  %v129_v23 = vld [vmem:[%s2981_s1 + $0x2f8] sm:$0xff] }
  0x3d   :  { %1178 = vmatpush1.bf16.msra.mxu1 %v1177_v56  ;;  %v1199_v56 = vpack.c.bf16 %v117_v51, %v115_v50  ;;  %v1399_v21 = vpack.c.bf16 %v317_v13, %v315_v12  ;;  %v127_v22 = vld [vmem:[%s2981_s1 + $0x2e8] sm:$0xff]  ;;  %v321_v26 = vld [vmem:[%s2981_s1 + $0x8f8] sm:$0xff]  ;;  %v318_v33 = vld [vmem:[%s2981_s1 + $0x8e0] sm:$0xff] }
  0x3e   :  { %1370 = vmatpush1.bf16.msra.mxu0 %v1369_v57  ;;  %1180 = vmatprep.subr.bf16.mxu1 %v1179_v58  ;;  %v114_v57 = vld [vmem:[%s2981_s1 + $0x280] sm:$0xff]  ;;  %v116_v58 = vld [vmem:[%s2981_s1 + $0x290] sm:$0xff]  ;;  %v319_v25 = vld [vmem:[%s2981_s1 + $0x8e8] sm:$0xff] }
  0x3f   :  { %1372 = vmatprep.subr.bf16.mxu0 %v1371_v62  ;;  %v119_v62 = vld [vmem:[%s2981_s1 + $0x2a8] sm:$0xff]  ;;  %v1201_v2 = vpack.c.bf16 %v116_v58, %v114_v57  ;;  %v1403_v34 = vpack.c.bf16 %v321_v26, %v319_v25  ;;  %v320_v35 = vld [vmem:[%s2981_s1 + $0x8f0] sm:$0xff]  ;;  %v133_v37 = vld [vmem:[%s2981_s1 + $0x318] sm:$0xff] }
  0x40   :  { %v30_v27 = vld [vmem:[%s2980_s0 + $0x48] sm:$0xff]  ;;  %v325_v39 = vld [vmem:[%s2981_s1 + $0x918] sm:$0xff]  ;;  %v1405_v41 = vpack.c.bf16 %v320_v35, %v318_v33  ;;  %v322_v45 = vld [vmem:[%s2981_s1 + $0x900] sm:$0xff] }
  0x41   :  { %1182 = vmatpush1.bf16.msra.mxu1 %v1181_v4  ;;  %v1203_v4 = vpack.c.bf16 %v121_v63, %v119_v62  ;;  %v323_v38 = vld [vmem:[%s2981_s1 + $0x908] sm:$0xff]  ;;  %v324_v47 = vld [vmem:[%s2981_s1 + $0x910] sm:$0xff]  ;;  %v137_v49 = vld [vmem:[%s2981_s1 + $0x338] sm:$0xff] }
  0x42   :  { %1374 = vmatpush1.bf16.msra.mxu0 %v1373_v5  ;;  %1184 = vmatprep.subr.bf16.mxu1 %v1183_v6  ;;  %v118_v5 = vld [vmem:[%s2981_s1 + $0x2a0] sm:$0xff]  ;;  %v120_v6 = vld [vmem:[%s2981_s1 + $0x2b0] sm:$0xff]  ;;  %v1407_v46 = vpack.c.bf16 %v325_v39, %v323_v38  ;;  %v327_v50 = vld [vmem:[%s2981_s1 + $0x928] sm:$0xff]  ;;  %v1409_v53 = vpack.c.bf16 %v324_v47, %v322_v45 }
  0x43   :  { %1376 = vmatprep.subr.bf16.mxu0 %v1375_v10  ;;  %v123_v10 = vld [vmem:[%s2981_s1 + $0x2c8] sm:$0xff]  ;;  %v1205_v14 = vpack.c.bf16 %v120_v6, %v118_v5  ;;  %v329_v51 = vld [vmem:[%s2981_s1 + $0x938] sm:$0xff]  ;;  %v326_v57 = vld [vmem:[%s2981_s1 + $0x920] sm:$0xff] }
  0x44   :  { %515 = vmatmul.mubr.f32.vlgmr.msra.gmra.mrb[0].mxu1 %v21_v16  ;;  %v1397_v16 = vpack.c.bf16 %v312_v9, %v310_v7  ;;  %v1411_v58 = vpack.c.bf16 %v329_v51, %v327_v50  ;;  %v328_v59 = vld [vmem:[%s2981_s1 + $0x930] sm:$0xff]  ;;  %v141_v61 = vld [vmem:[%s2981_s1 + $0x358] sm:$0xff]  ;;  %v331_v62 = vld [vmem:[%s2981_s1 + $0x948] sm:$0xff] }
  0x45   :  { %1186 = vmatpush1.bf16.msra.mxu1 %v1185_v17  ;;  %728 = vmatmul.mubr.f32.vlgmr.msra.gmra.mrb[0].mxu0 %v27_v18  ;;  %v1207_v17 = vpack.c.bf16 %v125_v11, %v123_v10  ;;  %v124_v18 = vld [vmem:[%s2981_s1 + $0x2d0] sm:$0xff]  ;;  %v333_v63 = vld [vmem:[%s2981_s1 + $0x958] sm:$0xff]  ;;  %v1413_v1 = vpack.c.bf16 %v328_v59, %v326_v57  ;;  %v330_v5 = vld [vmem:[%s2981_s1 + $0x940] sm:$0xff] }
  0x46   :  { %1378 = vmatpush1.bf16.msra.mxu0 %v1377_v19  ;;  %1188 = vmatprep.subr.bf16.mxu1 %v1187_v20  ;;  %v314_v19 = vld [vmem:[%s2981_s1 + $0x8c0] sm:$0xff]  ;;  %v316_v20 = vld [vmem:[%s2981_s1 + $0x8d0] sm:$0xff]  ;;  %v1209_v28 = vpack.c.bf16 %v124_v18, %v122_v15  ;;  %v1415_v6 = vpack.c.bf16 %v333_v63, %v331_v62  ;;  %v145_v9 = vld [vmem:[%s2981_s1 + $0x378] sm:$0xff] }
  0x47   :  { %1380 = vmatprep.subr.bf16.mxu0 %v1379_v24  ;;  %v24_v24 = vld [vmem:[%s2980_s0 + $0x18] sm:$0xff]  ;;  %798 = vmatprep.mubr.f32.mxu0 %v30_v27  ;;  %v1401_v29 = vpack.c.bf16 %v316_v20, %v314_v19  ;;  %v332_v7 = vld [vmem:[%s2981_s1 + $0x950] sm:$0xff]  ;;  %v335_v10 = vld [vmem:[%s2981_s1 + $0x968] sm:$0xff] }
  0x48   :  { %585 = vmatprep.mubr.f32.mxu1 %v24_v24  ;;  %v337_v11 = vld [vmem:[%s2981_s1 + $0x978] sm:$0xff]  ;;  %v1417_v13 = vpack.c.bf16 %v332_v7, %v330_v5  ;;  %v142_v15 = vld [vmem:[%s2981_s1 + $0x360] sm:$0xff]  ;;  %v336_v19 = vld [vmem:[%s2981_s1 + $0x970] sm:$0xff] }
  0x49   :  { %1190 = vmatpush1.bf16.msra.mxu1 %v1189_v30  ;;  %v1211_v30 = vpack.c.bf16 %v129_v23, %v127_v22  ;;  %v1419_v18 = vpack.c.bf16 %v337_v11, %v335_v10  ;;  %v147_v20 = vld [vmem:[%s2981_s1 + $0x388] sm:$0xff]  ;;  %v341_v23 = vld [vmem:[%s2981_s1 + $0x998] sm:$0xff]  ;;  %v146_v27 = vld [vmem:[%s2981_s1 + $0x380] sm:$0xff] }
  0x4a   :  { %1382 = vmatpush1.bf16.msra.mxu0 %v1381_v31  ;;  %1192 = vmatprep.subr.bf16.mxu1 %v1191_v32  ;;  %v126_v31 = vld [vmem:[%s2981_s1 + $0x2e0] sm:$0xff]  ;;  %v128_v32 = vld [vmem:[%s2981_s1 + $0x2f0] sm:$0xff]  ;;  %v339_v22 = vld [vmem:[%s2981_s1 + $0x988] sm:$0xff] }
  0x4b   :  { %1384 = vmatprep.subr.bf16.mxu0 %v1383_v36  ;;  %v131_v36 = vld [vmem:[%s2981_s1 + $0x308] sm:$0xff]  ;;  %v1213_v40 = vpack.c.bf16 %v128_v32, %v126_v31  ;;  %v340_v31 = vld [vmem:[%s2981_s1 + $0x990] sm:$0xff]  ;;  %v153_v33 = vld [vmem:[%s2981_s1 + $0x3b8] sm:$0xff] }
  0x4c   :  { %v151_v32 = vld [vmem:[%s2981_s1 + $0x3a8] sm:$0xff]  ;;  %v345_v35 = vld [vmem:[%s2981_s1 + $0x9b8] sm:$0xff]  ;;  %v150_v39 = vld [vmem:[%s2981_s1 + $0x3a0] sm:$0xff] }
  0x4d   :  { %1194 = vmatpush1.bf16.msra.mxu1 %v1193_v42  ;;  %v1215_v42 = vpack.c.bf16 %v133_v37, %v131_v36  ;;  %v1235_v38 = vpack.c.bf16 %v153_v33, %v151_v32  ;;  %v157_v45 = vld [vmem:[%s2981_s1 + $0x3d8] sm:$0xff]  ;;  %v154_v51 = vld [vmem:[%s2981_s1 + $0x3c0] sm:$0xff]  ;;  %v363_v32 = vld [vmem:[%s2981_s1 + $0xa48] sm:$0xff] }
  0x4e   :  { %1386 = vmatpush1.bf16.msra.mxu0 %v1385_v43  ;;  %1196 = vmatprep.subr.bf16.mxu1 %v1195_v44  ;;  %v130_v43 = vld [vmem:[%s2981_s1 + $0x300] sm:$0xff]  ;;  %v132_v44 = vld [vmem:[%s2981_s1 + $0x310] sm:$0xff]  ;;  %v349_v47 = vld [vmem:[%s2981_s1 + $0x9d8] sm:$0xff] }
  0x4f   :  { %1388 = vmatprep.subr.bf16.mxu0 %v1387_v48  ;;  %v135_v48 = vld [vmem:[%s2981_s1 + $0x328] sm:$0xff]  ;;  %v1217_v52 = vpack.c.bf16 %v132_v44, %v130_v43  ;;  %v344_v43 = vld [vmem:[%s2981_s1 + $0x9b0] sm:$0xff]  ;;  %v161_v57 = vld [vmem:[%s2981_s1 + $0x3f8] sm:$0xff] }
  0x50   :  { %v155_v44 = vld [vmem:[%s2981_s1 + $0x3c8] sm:$0xff]  ;;  %v353_v59 = vld [vmem:[%s2981_s1 + $0x9f8] sm:$0xff]  ;;  %v158_v63 = vld [vmem:[%s2981_s1 + $0x3e0] sm:$0xff] }
  0x51   :  { %1198 = vmatpush1.bf16.msra.mxu1 %v1197_v54  ;;  %v1219_v54 = vpack.c.bf16 %v137_v49, %v135_v48  ;;  %v1239_v50 = vpack.c.bf16 %v157_v45, %v155_v44  ;;  %v165_v5 = vld [vmem:[%s2981_s1 + $0x418] sm:$0xff]  ;;  %v162_v11 = vld [vmem:[%s2981_s1 + $0x400] sm:$0xff]  ;;  %v175_v44 = vld [vmem:[%s2981_s1 + $0x468] sm:$0xff] }
  0x52   :  { %1390 = vmatpush1.bf16.msra.mxu0 %v1389_v55  ;;  %1200 = vmatprep.subr.bf16.mxu1 %v1199_v56  ;;  %v134_v55 = vld [vmem:[%s2981_s1 + $0x320] sm:$0xff]  ;;  %v136_v56 = vld [vmem:[%s2981_s1 + $0x330] sm:$0xff]  ;;  %v357_v7 = vld [vmem:[%s2981_s1 + $0xa18] sm:$0xff] }
  0x53   :  { %1392 = vmatprep.subr.bf16.mxu0 %v1391_v60  ;;  %v139_v60 = vld [vmem:[%s2981_s1 + $0x348] sm:$0xff]  ;;  %v1221_v0 = vpack.c.bf16 %v136_v56, %v134_v55  ;;  %v348_v55 = vld [vmem:[%s2981_s1 + $0x9d0] sm:$0xff]  ;;  %v365_v33 = vld [vmem:[%s2981_s1 + $0xa58] sm:$0xff] }
  0x54   :  { %v159_v56 = vld [vmem:[%s2981_s1 + $0x3e8] sm:$0xff]  ;;  %v177_v45 = vld [vmem:[%s2981_s1 + $0x478] sm:$0xff] }
  0x55   :  { %1202 = vmatpush1.bf16.msra.mxu1 %v1201_v2  ;;  %v1223_v2 = vpack.c.bf16 %v141_v61, %v139_v60  ;;  %v1243_v62 = vpack.c.bf16 %v161_v57, %v159_v56  ;;  %v179_v56 = vld [vmem:[%s2981_s1 + $0x488] sm:$0xff]  ;;  %v181_v57 = vld [vmem:[%s2981_s1 + $0x498] sm:$0xff] }
  0x56   :  { %1394 = vmatpush1.bf16.msra.mxu0 %v1393_v3  ;;  %1204 = vmatprep.subr.bf16.mxu1 %v1203_v4  ;;  %v138_v3 = vld [vmem:[%s2981_s1 + $0x340] sm:$0xff]  ;;  %v140_v4 = vld [vmem:[%s2981_s1 + $0x350] sm:$0xff] }
  0x57   :  { %1396 = vmatprep.subr.bf16.mxu0 %v1395_v8  ;;  %v143_v8 = vld [vmem:[%s2981_s1 + $0x368] sm:$0xff]  ;;  %v1225_v12 = vpack.c.bf16 %v140_v4, %v138_v3  ;;  %v352_v3 = vld [vmem:[%s2981_s1 + $0x9f0] sm:$0xff] }
  0x58   :  { %v163_v4 = vld [vmem:[%s2981_s1 + $0x408] sm:$0xff] }
  0x59   :  { %1206 = vmatpush1.bf16.msra.mxu1 %v1205_v14  ;;  %v1227_v14 = vpack.c.bf16 %v145_v9, %v143_v8  ;;  %v1247_v10 = vpack.c.bf16 %v165_v5, %v163_v4 }
  0x5a   :  { %1398 = vmatpush1.bf16.msra.mxu0 %v1397_v16  ;;  %1208 = vmatprep.subr.bf16.mxu1 %v1207_v17  ;;  %v144_v16 = vld [vmem:[%s2981_s1 + $0x370] sm:$0xff]  ;;  %v334_v17 = vld [vmem:[%s2981_s1 + $0x960] sm:$0xff] }
  0x5b   :  { %1400 = vmatprep.subr.bf16.mxu0 %v1399_v21  ;;  %v149_v21 = vld [vmem:[%s2981_s1 + $0x398] sm:$0xff]  ;;  %v1229_v24 = vpack.c.bf16 %v144_v16, %v142_v15  ;;  %v1421_v25 = vpack.c.bf16 %v336_v19, %v334_v17  ;;  %v356_v15 = vld [vmem:[%s2981_s1 + $0xa10] sm:$0xff]  ;;  %v167_v16 = vld [vmem:[%s2981_s1 + $0x428] sm:$0xff] }
  0x5c   :  { %v1231_v26 = vpack.c.bf16 %v149_v21, %v147_v20  ;;  %v169_v17 = vld [vmem:[%s2981_s1 + $0x438] sm:$0xff]  ;;  %v23_v20 = vld [vmem:[%s2980_s0 + $0x10] sm:$0xff] }
  0x5d   :  { %1210 = vmatpush1.bf16.msra.mxu1 %v1209_v28  ;;  %v148_v28 = vld [vmem:[%s2981_s1 + $0x390] sm:$0xff]  ;;  %v361_v19 = vld [vmem:[%s2981_s1 + $0xa38] sm:$0xff] }
  0x5e   :  { %1402 = vmatpush1.bf16.msra.mxu0 %v1401_v29  ;;  %1212 = vmatprep.subr.bf16.mxu1 %v1211_v30  ;;  %v338_v29 = vld [vmem:[%s2981_s1 + $0x980] sm:$0xff]  ;;  %v1423_v30 = vpack.c.bf16 %v341_v23, %v339_v22  ;;  %v1233_v36 = vpack.c.bf16 %v148_v28, %v146_v27 }
  0x5f   :  { %1404 = vmatprep.subr.bf16.mxu0 %v1403_v34  ;;  %v343_v34 = vld [vmem:[%s2981_s1 + $0x9a8] sm:$0xff]  ;;  %v1425_v37 = vpack.c.bf16 %v340_v31, %v338_v29  ;;  %v29_v22 = vld [vmem:[%s2980_s0 + $0x40] sm:$0xff]  ;;  %v360_v29 = vld [vmem:[%s2981_s1 + $0xa30] sm:$0xff] }
  0x60   :  { %v358_v27 = vld [vmem:[%s2981_s1 + $0xa20] sm:$0xff]  ;;  %v173_v31 = vld [vmem:[%s2981_s1 + $0x458] sm:$0xff] }
  0x61   :  { %1214 = vmatpush1.bf16.msra.mxu1 %v1213_v40  ;;  %v152_v40 = vld [vmem:[%s2981_s1 + $0x3b0] sm:$0xff] }
  0x62   :  { %1406 = vmatpush1.bf16.msra.mxu0 %v1405_v41  ;;  %1216 = vmatprep.subr.bf16.mxu1 %v1215_v42  ;;  %v342_v41 = vld [vmem:[%s2981_s1 + $0x9a0] sm:$0xff]  ;;  %v1427_v42 = vpack.c.bf16 %v345_v35, %v343_v34  ;;  %v1237_v48 = vpack.c.bf16 %v152_v40, %v150_v39  ;;  %v26_v34 = vld [vmem:[%s2980_s0 + $0x28] sm:$0xff]  ;;  %v172_v40 = vld [vmem:[%s2981_s1 + $0x450] sm:$0xff] }
  0x63   :  { %1408 = vmatprep.subr.bf16.mxu0 %v1407_v46  ;;  %v347_v46 = vld [vmem:[%s2981_s1 + $0x9c8] sm:$0xff]  ;;  %v1429_v49 = vpack.c.bf16 %v344_v43, %v342_v41  ;;  %v170_v39 = vld [vmem:[%s2981_s1 + $0x440] sm:$0xff]  ;;  %v364_v43 = vld [vmem:[%s2981_s1 + $0xa50] sm:$0xff] }
  0x64   :  { %v362_v41 = vld [vmem:[%s2981_s1 + $0xa40] sm:$0xff] }
  0x65   :  { %1218 = vmatpush1.bf16.msra.mxu1 %v1217_v52  ;;  %v156_v52 = vld [vmem:[%s2981_s1 + $0x3d0] sm:$0xff] }
  0x66   :  { %1410 = vmatpush1.bf16.msra.mxu0 %v1409_v53  ;;  %1220 = vmatprep.subr.bf16.mxu1 %v1219_v54  ;;  %v346_v53 = vld [vmem:[%s2981_s1 + $0x9c0] sm:$0xff]  ;;  %v1431_v54 = vpack.c.bf16 %v349_v47, %v347_v46  ;;  %v1241_v60 = vpack.c.bf16 %v156_v52, %v154_v51  ;;  %v367_v46 = vld [vmem:[%s2981_s1 + $0xa68] sm:$0xff]  ;;  %v369_v47 = vld [vmem:[%s2981_s1 + $0xa78] sm:$0xff] }
  0x67   :  { %1412 = vmatprep.subr.bf16.mxu0 %v1411_v58  ;;  %v351_v58 = vld [vmem:[%s2981_s1 + $0x9e8] sm:$0xff]  ;;  %v1433_v61 = vpack.c.bf16 %v348_v55, %v346_v53  ;;  %v174_v51 = vld [vmem:[%s2981_s1 + $0x460] sm:$0xff]  ;;  %v176_v52 = vld [vmem:[%s2981_s1 + $0x470] sm:$0xff] }
  0x68   :  { %v366_v53 = vld [vmem:[%s2981_s1 + $0xa60] sm:$0xff]  ;;  %v368_v55 = vld [vmem:[%s2981_s1 + $0xa70] sm:$0xff] }
  0x69   :  { %1222 = vmatpush1.bf16.msra.mxu1 %v1221_v0  ;;  %v160_v0 = vld [vmem:[%s2981_s1 + $0x3f0] sm:$0xff] }
  0x6a   :  { %1414 = vmatpush1.bf16.msra.mxu0 %v1413_v1  ;;  %1224 = vmatprep.subr.bf16.mxu1 %v1223_v2  ;;  %v350_v1 = vld [vmem:[%s2981_s1 + $0x9e0] sm:$0xff]  ;;  %v1435_v2 = vpack.c.bf16 %v353_v59, %v351_v58  ;;  %v1245_v8 = vpack.c.bf16 %v160_v0, %v158_v63  ;;  %v371_v58 = vld [vmem:[%s2981_s1 + $0xa88] sm:$0xff]  ;;  %v373_v59 = vld [vmem:[%s2981_s1 + $0xa98] sm:$0xff]  ;;  %v1263_v63 = vpack.c.bf16 %v181_v57, %v179_v56 }
  0x6b   :  { %1416 = vmatprep.subr.bf16.mxu0 %v1415_v6  ;;  %v355_v6 = vld [vmem:[%s2981_s1 + $0xa08] sm:$0xff]  ;;  %v1437_v9 = vpack.c.bf16 %v352_v3, %v350_v1  ;;  %v180_v0 = vld [vmem:[%s2981_s1 + $0x490] sm:$0xff]  ;;  %v370_v1 = vld [vmem:[%s2981_s1 + $0xa80] sm:$0xff] }
  0x6d   :  { %1226 = vmatpush1.bf16.msra.mxu1 %v1225_v12  ;;  %v164_v12 = vld [vmem:[%s2981_s1 + $0x410] sm:$0xff] }
  0x6e   :  { %1418 = vmatpush1.bf16.msra.mxu0 %v1417_v13  ;;  %1228 = vmatprep.subr.bf16.mxu1 %v1227_v14  ;;  %v354_v13 = vld [vmem:[%s2981_s1 + $0xa00] sm:$0xff]  ;;  %v1439_v14 = vpack.c.bf16 %v357_v7, %v355_v6  ;;  %v1249_v21 = vpack.c.bf16 %v164_v12, %v162_v11 }
  0x6f   :  { %1420 = vmatprep.subr.bf16.mxu0 %v1419_v18  ;;  %v359_v18 = vld [vmem:[%s2981_s1 + $0xa28] sm:$0xff]  ;;  %v1441_v23 = vpack.c.bf16 %v356_v15, %v354_v13 }
  0x70   :  { %v1443_v28 = vpack.c.bf16 %v361_v19, %v359_v18 }
  0x71   :  { %1230 = vmatpush1.bf16.msra.mxu1 %v1229_v24  ;;  %v1251_v24 = vpack.c.bf16 %v169_v17, %v167_v16 }
  0x72   :  { %1422 = vmatpush1.bf16.msra.mxu0 %v1421_v25  ;;  %1232 = vmatprep.subr.bf16.mxu1 %v1231_v26  ;;  %v166_v25 = vld [vmem:[%s2981_s1 + $0x420] sm:$0xff]  ;;  %v168_v26 = vld [vmem:[%s2981_s1 + $0x430] sm:$0xff] }
  0x73   :  { %1424 = vmatprep.subr.bf16.mxu0 %v1423_v30  ;;  %v171_v30 = vld [vmem:[%s2981_s1 + $0x448] sm:$0xff]  ;;  %v1253_v35 = vpack.c.bf16 %v168_v26, %v166_v25 }
  0x75   :  { %1234 = vmatpush1.bf16.msra.mxu1 %v1233_v36  ;;  %v32_v36 = vld [vmem:[%s2980_s0 + $0x58] sm:$0xff] }
  0x76   :  { %1426 = vmatpush1.bf16.msra.mxu0 %v1425_v37  ;;  %1236 = vmatprep.subr.bf16.mxu1 %v1235_v38  ;;  %v1445_v37 = vpack.c.bf16 %v360_v29, %v358_v27  ;;  %v1255_v38 = vpack.c.bf16 %v173_v31, %v171_v30 }
  0x77   :  { %1428 = vmatprep.subr.bf16.mxu0 %v1427_v42  ;;  %v1447_v42 = vpack.c.bf16 %v365_v33, %v363_v32 }
  0x79   :  { %1238 = vmatpush1.bf16.msra.mxu1 %v1237_v48  ;;  %v1257_v48 = vpack.c.bf16 %v172_v40, %v170_v39 }
  0x7a   :  { %1430 = vmatpush1.bf16.msra.mxu0 %v1429_v49  ;;  %1240 = vmatprep.subr.bf16.mxu1 %v1239_v50  ;;  %v1449_v49 = vpack.c.bf16 %v364_v43, %v362_v41  ;;  %v1259_v50 = vpack.c.bf16 %v177_v45, %v175_v44 }
  0x7b   :  { %1432 = vmatprep.subr.bf16.mxu0 %v1431_v54  ;;  %v1451_v54 = vpack.c.bf16 %v369_v47, %v367_v46 }
  0x7d   :  { %1242 = vmatpush1.bf16.msra.mxu1 %v1241_v60  ;;  %v1261_v60 = vpack.c.bf16 %v176_v52, %v174_v51 }
  0x7e   :  { %1434 = vmatpush1.bf16.msra.mxu0 %v1433_v61  ;;  %1244 = vmatprep.subr.bf16.mxu1 %v1243_v62  ;;  %v178_v61 = vld [vmem:[%s2981_s1 + $0x480] sm:$0xff]  ;;  %v1453_v62 = vpack.c.bf16 %v368_v55, %v366_v53 }
  0x7f   :  { %1436 = vmatprep.subr.bf16.mxu0 %v1435_v2 }
  0x81   :  { %1246 = vmatpush1.bf16.msra.mxu1 %v1245_v8 }
  0x82   :  { %1438 = vmatpush1.bf16.msra.mxu0 %v1437_v9  ;;  %1248 = vmatprep.subr.bf16.mxu1 %v1247_v10 }
  0x83   :  { %1440 = vmatprep.subr.bf16.mxu0 %v1439_v14 }
  0x84   :  { %586 = vmatmul.mubr.f32.vlgmr.msra.gmra.mrb[0].mxu1 %v23_v20 }
  0x85   :  { %1250 = vmatpush1.bf16.msra.mxu1 %v1249_v21  ;;  %799 = vmatmul.mubr.f32.vlgmr.msra.gmra.mrb[0].mxu0 %v29_v22 }
  0x86   :  { %1442 = vmatpush1.bf16.msra.mxu0 %v1441_v23  ;;  %1252 = vmatprep.subr.bf16.mxu1 %v1251_v24 }
  0x87   :  { %1444 = vmatprep.subr.bf16.mxu0 %v1443_v28  ;;  %656 = vmatprep.mubr.f32.mxu1 %v26_v34 }
  0x88   :  { %869 = vmatprep.mubr.f32.mxu0 %v32_v36 }
  0x89   :  { %1254 = vmatpush1.bf16.msra.mxu1 %v1253_v35 }
  0x8a   :  { %1446 = vmatpush1.bf16.msra.mxu0 %v1445_v37  ;;  %1256 = vmatprep.subr.bf16.mxu1 %v1255_v38 }
  0x8b   :  { %1448 = vmatprep.subr.bf16.mxu0 %v1447_v42 }
  0x8d   :  { %1258 = vmatpush1.bf16.msra.mxu1 %v1257_v48 }
  0x8e   :  { %1450 = vmatpush1.bf16.msra.mxu0 %v1449_v49  ;;  %1260 = vmatprep.subr.bf16.mxu1 %v1259_v50 }
  0x8f   :  { %10 = vsyncpa [#allocation3], 0  ;;  %1452 = vmatprep.subr.bf16.mxu0 %v1451_v54  ;;  %v1455_v2 = vpack.c.bf16 %v373_v59, %v371_v58  ;;  %v372_v3 = vld [vmem:[%s2981_s1 + $0xa90] sm:$0xff]  ;;  %v183_v4 = vld [vmem:[%s2981_s1 + $0x4a8] sm:$0xff]  ;;  %v1265_v8 = vpack.c.bf16 %v180_v0, %v178_v61  ;;  %vm446_vm0 = vcmask 523264  }
  0x90   :  { %v185_v5 = vld [vmem:[%s2981_s1 + $0x4b8] sm:$0xff]  ;;  %v375_v6 = vld [vmem:[%s2981_s1 + $0xaa8] sm:$0xff]  ;;  %v1457_v9 = vpack.c.bf16 %v372_v3, %v370_v1  ;;  %v182_v11 = vld [vmem:[%s2981_s1 + $0x4a0] sm:$0xff] }
  0x91   :  { %v377_v7 = vld [vmem:[%s2981_s1 + $0xab8] sm:$0xff]  ;;  %1262 = vmatpush1.bf16.msra.mxu1 %v1261_v60  ;;  %v1267_v10 = vpack.c.bf16 %v185_v5, %v183_v4  ;;  %v184_v12 = vld [vmem:[%s2981_s1 + $0x4b0] sm:$0xff]  ;;  %v374_v13 = vld [vmem:[%s2981_s1 + $0xaa0] sm:$0xff] }
  0x92   :  { %1454 = vmatpush1.bf16.msra.mxu0 %v1453_v62  ;;  %1264 = vmatprep.subr.bf16.mxu1 %v1263_v63  ;;  %v1459_v14 = vpack.c.bf16 %v377_v7, %v375_v6  ;;  %v376_v15 = vld [vmem:[%s2981_s1 + $0xab0] sm:$0xff]  ;;  %v187_v16 = vld [vmem:[%s2981_s1 + $0x4c8] sm:$0xff]  ;;  %v189_v17 = vld [vmem:[%s2981_s1 + $0x4d8] sm:$0xff]  ;;  %v1269_v20 = vpack.c.bf16 %v184_v12, %v182_v11 }
  0x93   :  { %1456 = vmatprep.subr.bf16.mxu0 %v1455_v2  ;;  %v379_v18 = vld [vmem:[%s2981_s1 + $0xac8] sm:$0xff]  ;;  %v381_v19 = vld [vmem:[%s2981_s1 + $0xad8] sm:$0xff]  ;;  %v1461_v21 = vpack.c.bf16 %v376_v15, %v374_v13  ;;  %v1271_v22 = vpack.c.bf16 %v189_v17, %v187_v16  ;;  %v186_v23 = vld [vmem:[%s2981_s1 + $0x4c0] sm:$0xff] }
  0x94   :  { %v188_v24 = vld [vmem:[%s2981_s1 + $0x4d0] sm:$0xff]  ;;  %v378_v25 = vld [vmem:[%s2981_s1 + $0xac0] sm:$0xff]  ;;  %v1463_v26 = vpack.c.bf16 %v381_v19, %v379_v18  ;;  %v191_v28 = vld [vmem:[%s2981_s1 + $0x4e8] sm:$0xff] }
  0x95   :  { %1266 = vmatpush1.bf16.msra.mxu1 %v1265_v8  ;;  %v380_v27 = vld [vmem:[%s2981_s1 + $0xad0] sm:$0xff]  ;;  %v193_v29 = vld [vmem:[%s2981_s1 + $0x4f8] sm:$0xff]  ;;  %v383_v30 = vld [vmem:[%s2981_s1 + $0xae8] sm:$0xff]  ;;  %v1273_v32 = vpack.c.bf16 %v188_v24, %v186_v23 }
  0x96   :  { %1458 = vmatpush1.bf16.msra.mxu0 %v1457_v9  ;;  %1268 = vmatprep.subr.bf16.mxu1 %v1267_v10  ;;  %v385_v31 = vld [vmem:[%s2981_s1 + $0xaf8] sm:$0xff]  ;;  %v1465_v33 = vpack.c.bf16 %v380_v27, %v378_v25  ;;  %v1275_v34 = vpack.c.bf16 %v193_v29, %v191_v28  ;;  %v190_v35 = vld [vmem:[%s2981_s1 + $0x4e0] sm:$0xff]  ;;  %v192_v36 = vld [vmem:[%s2981_s1 + $0x4f0] sm:$0xff] }
  0x97   :  { %1460 = vmatprep.subr.bf16.mxu0 %v1459_v14  ;;  %v382_v37 = vld [vmem:[%s2981_s1 + $0xae0] sm:$0xff]  ;;  %v1467_v38 = vpack.c.bf16 %v385_v31, %v383_v30  ;;  %v384_v39 = vld [vmem:[%s2981_s1 + $0xaf0] sm:$0xff]  ;;  %v195_v40 = vld [vmem:[%s2981_s1 + $0x508] sm:$0xff]  ;;  %v1277_v44 = vpack.c.bf16 %v192_v36, %v190_v35 }
  0x98   :  { %v197_v41 = vld [vmem:[%s2981_s1 + $0x518] sm:$0xff]  ;;  %v387_v42 = vld [vmem:[%s2981_s1 + $0xb08] sm:$0xff]  ;;  %v1469_v45 = vpack.c.bf16 %v384_v39, %v382_v37  ;;  %v194_v47 = vld [vmem:[%s2981_s1 + $0x500] sm:$0xff] }
  0x99   :  { %1270 = vmatpush1.bf16.msra.mxu1 %v1269_v20  ;;  %v389_v43 = vld [vmem:[%s2981_s1 + $0xb18] sm:$0xff]  ;;  %v1279_v46 = vpack.c.bf16 %v197_v41, %v195_v40  ;;  %v196_v48 = vld [vmem:[%s2981_s1 + $0x510] sm:$0xff]  ;;  %v386_v49 = vld [vmem:[%s2981_s1 + $0xb00] sm:$0xff] }
  0x9a   :  { %1462 = vmatpush1.bf16.msra.mxu0 %v1461_v21  ;;  %1272 = vmatprep.subr.bf16.mxu1 %v1271_v22  ;;  %v1471_v50 = vpack.c.bf16 %v389_v43, %v387_v42  ;;  %v388_v51 = vld [vmem:[%s2981_s1 + $0xb10] sm:$0xff]  ;;  %v199_v52 = vld [vmem:[%s2981_s1 + $0x528] sm:$0xff]  ;;  %v201_v53 = vld [vmem:[%s2981_s1 + $0x538] sm:$0xff]  ;;  %v1281_v56 = vpack.c.bf16 %v196_v48, %v194_v47 }
  0x9b   :  { %1464 = vmatprep.subr.bf16.mxu0 %v1463_v26  ;;  %v391_v54 = vld [vmem:[%s2981_s1 + $0xb28] sm:$0xff]  ;;  %v393_v55 = vld [vmem:[%s2981_s1 + $0xb38] sm:$0xff]  ;;  %v1473_v57 = vpack.c.bf16 %v388_v51, %v386_v49  ;;  %v1283_v58 = vpack.c.bf16 %v201_v53, %v199_v52  ;;  %v198_v59 = vld [vmem:[%s2981_s1 + $0x520] sm:$0xff] }
  0x9c   :  { %v200_v60 = vld [vmem:[%s2981_s1 + $0x530] sm:$0xff]  ;;  %v390_v61 = vld [vmem:[%s2981_s1 + $0xb20] sm:$0xff]  ;;  %v1475_v62 = vpack.c.bf16 %v393_v55, %v391_v54  ;;  %v203_v0 = vld [vmem:[%s2981_s1 + $0x548] sm:$0xff] }
  0x9d   :  { %1274 = vmatpush1.bf16.msra.mxu1 %v1273_v32  ;;  %v392_v63 = vld [vmem:[%s2981_s1 + $0xb30] sm:$0xff]  ;;  %v205_v1 = vld [vmem:[%s2981_s1 + $0x558] sm:$0xff]  ;;  %v395_v2 = vld [vmem:[%s2981_s1 + $0xb48] sm:$0xff]  ;;  %v1285_v4 = vpack.c.bf16 %v200_v60, %v198_v59 }
  0x9e   :  { %1466 = vmatpush1.bf16.msra.mxu0 %v1465_v33  ;;  %1276 = vmatprep.subr.bf16.mxu1 %v1275_v34  ;;  %v397_v3 = vld [vmem:[%s2981_s1 + $0xb58] sm:$0xff]  ;;  %v1477_v5 = vpack.c.bf16 %v392_v63, %v390_v61  ;;  %v1287_v6 = vpack.c.bf16 %v205_v1, %v203_v0  ;;  %v202_v7 = vld [vmem:[%s2981_s1 + $0x540] sm:$0xff]  ;;  %v204_v8 = vld [vmem:[%s2981_s1 + $0x550] sm:$0xff] }
  0x9f   :  { %1468 = vmatprep.subr.bf16.mxu0 %v1467_v38  ;;  %v394_v9 = vld [vmem:[%s2981_s1 + $0xb40] sm:$0xff]  ;;  %v1479_v10 = vpack.c.bf16 %v397_v3, %v395_v2  ;;  %v396_v11 = vld [vmem:[%s2981_s1 + $0xb50] sm:$0xff]  ;;  %v207_v12 = vld [vmem:[%s2981_s1 + $0x568] sm:$0xff]  ;;  %v1289_v16 = vpack.c.bf16 %v204_v8, %v202_v7 }
  0xa0   :  { %v209_v13 = vld [vmem:[%s2981_s1 + $0x578] sm:$0xff]  ;;  %v399_v14 = vld [vmem:[%s2981_s1 + $0xb68] sm:$0xff]  ;;  %v1481_v17 = vpack.c.bf16 %v396_v11, %v394_v9  ;;  %v206_v19 = vld [vmem:[%s2981_s1 + $0x560] sm:$0xff] }
  0xa1   :  { %1278 = vmatpush1.bf16.msra.mxu1 %v1277_v44  ;;  %v401_v15 = vld [vmem:[%s2981_s1 + $0xb78] sm:$0xff]  ;;  %v1291_v18 = vpack.c.bf16 %v209_v13, %v207_v12  ;;  %v208_v20 = vld [vmem:[%s2981_s1 + $0x570] sm:$0xff]  ;;  %v398_v21 = vld [vmem:[%s2981_s1 + $0xb60] sm:$0xff] }
  0xa2   :  { %1470 = vmatpush1.bf16.msra.mxu0 %v1469_v45  ;;  %1280 = vmatprep.subr.bf16.mxu1 %v1279_v46  ;;  %v1483_v22 = vpack.c.bf16 %v401_v15, %v399_v14  ;;  %v400_v23 = vld [vmem:[%s2981_s1 + $0xb70] sm:$0xff]  ;;  %v211_v24 = vld [vmem:[%s2981_s1 + $0x588] sm:$0xff]  ;;  %v213_v25 = vld [vmem:[%s2981_s1 + $0x598] sm:$0xff]  ;;  %v1293_v28 = vpack.c.bf16 %v208_v20, %v206_v19 }
  0xa3   :  { %1472 = vmatprep.subr.bf16.mxu0 %v1471_v50  ;;  %v403_v26 = vld [vmem:[%s2981_s1 + $0xb88] sm:$0xff]  ;;  %v405_v27 = vld [vmem:[%s2981_s1 + $0xb98] sm:$0xff]  ;;  %v1485_v29 = vpack.c.bf16 %v400_v23, %v398_v21  ;;  %v1295_v30 = vpack.c.bf16 %v213_v25, %v211_v24  ;;  %v210_v31 = vld [vmem:[%s2981_s1 + $0x580] sm:$0xff] }
  0xa4   :  { %v212_v32 = vld [vmem:[%s2981_s1 + $0x590] sm:$0xff]  ;;  %v402_v33 = vld [vmem:[%s2981_s1 + $0xb80] sm:$0xff]  ;;  %v1487_v34 = vpack.c.bf16 %v405_v27, %v403_v26  ;;  %v215_v36 = vld [vmem:[%s2981_s1 + $0x5a8] sm:$0xff] }
  0xa5   :  { %1282 = vmatpush1.bf16.msra.mxu1 %v1281_v56  ;;  %v404_v35 = vld [vmem:[%s2981_s1 + $0xb90] sm:$0xff]  ;;  %v217_v37 = vld [vmem:[%s2981_s1 + $0x5b8] sm:$0xff]  ;;  %v407_v38 = vld [vmem:[%s2981_s1 + $0xba8] sm:$0xff]  ;;  %v1297_v40 = vpack.c.bf16 %v212_v32, %v210_v31 }
  0xa6   :  { %1474 = vmatpush1.bf16.msra.mxu0 %v1473_v57  ;;  %1284 = vmatprep.subr.bf16.mxu1 %v1283_v58  ;;  %v409_v39 = vld [vmem:[%s2981_s1 + $0xbb8] sm:$0xff]  ;;  %v1489_v41 = vpack.c.bf16 %v404_v35, %v402_v33  ;;  %v1299_v42 = vpack.c.bf16 %v217_v37, %v215_v36  ;;  %v214_v43 = vld [vmem:[%s2981_s1 + $0x5a0] sm:$0xff]  ;;  %v216_v44 = vld [vmem:[%s2981_s1 + $0x5b0] sm:$0xff] }
  0xa7   :  { %1476 = vmatprep.subr.bf16.mxu0 %v1475_v62  ;;  %v406_v45 = vld [vmem:[%s2981_s1 + $0xba0] sm:$0xff]  ;;  %v1491_v46 = vpack.c.bf16 %v409_v39, %v407_v38  ;;  %v408_v47 = vld [vmem:[%s2981_s1 + $0xbb0] sm:$0xff]  ;;  %v219_v48 = vld [vmem:[%s2981_s1 + $0x5c8] sm:$0xff]  ;;  %v1301_v52 = vpack.c.bf16 %v216_v44, %v214_v43 }
  0xa8   :  { %v221_v49 = vld [vmem:[%s2981_s1 + $0x5d8] sm:$0xff]  ;;  %v411_v50 = vld [vmem:[%s2981_s1 + $0xbc8] sm:$0xff]  ;;  %v1493_v53 = vpack.c.bf16 %v408_v47, %v406_v45  ;;  %v218_v55 = vld [vmem:[%s2981_s1 + $0x5c0] sm:$0xff] }
  0xa9   :  { %1286 = vmatpush1.bf16.msra.mxu1 %v1285_v4  ;;  %v413_v51 = vld [vmem:[%s2981_s1 + $0xbd8] sm:$0xff]  ;;  %v1303_v54 = vpack.c.bf16 %v221_v49, %v219_v48  ;;  %v220_v56 = vld [vmem:[%s2981_s1 + $0x5d0] sm:$0xff]  ;;  %v410_v57 = vld [vmem:[%s2981_s1 + $0xbc0] sm:$0xff] }
  0xaa   :  { %1478 = vmatpush1.bf16.msra.mxu0 %v1477_v5  ;;  %1288 = vmatprep.subr.bf16.mxu1 %v1287_v6  ;;  %v1495_v58 = vpack.c.bf16 %v413_v51, %v411_v50  ;;  %v412_v59 = vld [vmem:[%s2981_s1 + $0xbd0] sm:$0xff]  ;;  %v223_v60 = vld [vmem:[%s2981_s1 + $0x5e8] sm:$0xff]  ;;  %v225_v61 = vld [vmem:[%s2981_s1 + $0x5f8] sm:$0xff]  ;;  %v1305_v0 = vpack.c.bf16 %v220_v56, %v218_v55 }
  0xab   :  { %1480 = vmatprep.subr.bf16.mxu0 %v1479_v10  ;;  %v415_v62 = vld [vmem:[%s2981_s1 + $0xbe8] sm:$0xff]  ;;  %v417_v63 = vld [vmem:[%s2981_s1 + $0xbf8] sm:$0xff]  ;;  %v1497_v1 = vpack.c.bf16 %v412_v59, %v410_v57  ;;  %v1307_v2 = vpack.c.bf16 %v225_v61, %v223_v60  ;;  %v222_v3 = vld [vmem:[%s2981_s1 + $0x5e0] sm:$0xff] }
  0xac   :  { %v224_v4 = vld [vmem:[%s2981_s1 + $0x5f0] sm:$0xff]  ;;  %v414_v5 = vld [vmem:[%s2981_s1 + $0xbe0] sm:$0xff]  ;;  %v1499_v6 = vpack.c.bf16 %v417_v63, %v415_v62  ;;  %v966_v9 = vld [vmem:[%s2983_s3 + $0x88] sm:$0xff] }
  0xad   :  { %1290 = vmatpush1.bf16.msra.mxu1 %v1289_v16  ;;  %v416_v7 = vld [vmem:[%s2981_s1 + $0xbf0] sm:$0xff]  ;;  %v965_v8 = vld [vmem:[%s2983_s3 + $0x80] sm:$0xff]  ;;  %v419_v10 = vld [vmem:[%s2981_s1 + $0xc08] sm:$0xff]  ;;  %v1309_v12 = vpack.c.bf16 %v224_v4, %v222_v3 }
  0xae   :  { %1482 = vmatpush1.bf16.msra.mxu0 %v1481_v17  ;;  %1292 = vmatprep.subr.bf16.mxu1 %v1291_v18  ;;  %v421_v11 = vld [vmem:[%s2981_s1 + $0xc18] sm:$0xff]  ;;  %v1501_v13 = vpack.c.bf16 %v416_v7, %v414_v5  ;;  %v1519_v14 = vpack.c.bf16 %v966_v9, %v965_v8  ;;  %v949_v15 = vld [vmem:[%s2983_s3] sm:$0xff]  ;;  %v950_v16 = vld [vmem:[%s2983_s3 + $0x8] sm:$0xff] }
  0xaf   :  { %1484 = vmatprep.subr.bf16.mxu0 %v1483_v22  ;;  %v1503_v17 = vpack.c.bf16 %v421_v11, %v419_v10  ;;  %v418_v18 = vld [vmem:[%s2981_s1 + $0xc00] sm:$0xff]  ;;  %v420_v19 = vld [vmem:[%s2981_s1 + $0xc10] sm:$0xff]  ;;  %v423_v20 = vld [vmem:[%s2981_s1 + $0xc28] sm:$0xff]  ;;  %v1521_v26 = vpack.c.bf16 %v950_v16, %v949_v15 }
  0xb0   :  { %v425_v21 = vld [vmem:[%s2981_s1 + $0xc38] sm:$0xff]  ;;  %v967_v22 = vld [vmem:[%s2983_s3 + $0x90] sm:$0xff]  ;;  %v25_v24 = vld [vmem:[%s2980_s0 + $0x20] sm:$0xff]  ;;  %v1505_v27 = vpack.c.bf16 %v420_v19, %v418_v18 }
  0xb1   :  { %1294 = vmatpush1.bf16.msra.mxu1 %v1293_v28  ;;  %v968_v23 = vld [vmem:[%s2983_s3 + $0x98] sm:$0xff]  ;;  %v31_v25 = vld [vmem:[%s2980_s0 + $0x50] sm:$0xff]  ;;  %v422_v28 = vld [vmem:[%s2981_s1 + $0xc20] sm:$0xff]  ;;  %v1507_v31 = vpack.c.bf16 %v425_v21, %v423_v20 }
  0xb2   :  { %1486 = vmatpush1.bf16.msra.mxu0 %v1485_v29  ;;  %1296 = vmatprep.subr.bf16.mxu1 %v1295_v30  ;;  %v951_v29 = vld [vmem:[%s2983_s3 + $0x10] sm:$0xff]  ;;  %v952_v30 = vld [vmem:[%s2983_s3 + $0x18] sm:$0xff]  ;;  %v1523_v33 = vpack.c.bf16 %v968_v23, %v967_v22  ;;  %v970_v35 = vld [vmem:[%s2983_s3 + $0xa8] sm:$0xff]  ;;  %v436_v22 = vlaneseq }
  0xb3   :  { %1488 = vmatprep.subr.bf16.mxu0 %v1487_v34  ;;  %v424_v32 = vld [vmem:[%s2981_s1 + $0xc30] sm:$0xff]  ;;  %v969_v34 = vld [vmem:[%s2983_s3 + $0xa0] sm:$0xff]  ;;  %v427_v36 = vld [vmem:[%s2981_s1 + $0xc48] sm:$0xff]  ;;  %v1525_v38 = vpack.c.bf16 %v952_v30, %v951_v29 }
  0xb4   :  { %v429_v37 = vld [vmem:[%s2981_s1 + $0xc58] sm:$0xff]  ;;  %v1509_v39 = vpack.c.bf16 %v424_v32, %v422_v28  ;;  %v426_v43 = vld [vmem:[%s2981_s1 + $0xc40] sm:$0xff]  ;;  %v428_v44 = vld [vmem:[%s2981_s1 + $0xc50] sm:$0xff] }
  0xb5   :  { %1298 = vmatpush1.bf16.msra.mxu1 %v1297_v40  ;;  %v1595_v40 = vmov 0.0   ;;  %v431_v45 = vld [vmem:[%s2981_s1 + $0xc68] sm:$0xff]  ;;  %v1513_v47 = vpack.c.bf16 %v428_v44, %v426_v43  ;;  %v430_v49 = vld [vmem:[%s2981_s1 + $0xc60] sm:$0xff]  ;;  %v432_v50 = vld [vmem:[%s2981_s1 + $0xc70] sm:$0xff] }
  0xb6   :  { %1490 = vmatpush1.bf16.msra.mxu0 %v1489_v41  ;;  %1300 = vmatprep.subr.bf16.mxu1 %v1299_v42  ;;  %v1527_v41 = vpack.c.bf16 %v970_v35, %v969_v34  ;;  %v1511_v42 = vpack.c.bf16 %v429_v37, %v427_v36  ;;  %v1517_v51 = vpack.c.bf16 %v432_v50, %v430_v49  ;;  %v971_v56 = vld [vmem:[%s2983_s3 + $0xb0] sm:$0xff]  ;;  %v972_v57 = vld [vmem:[%s2983_s3 + $0xb8] sm:$0xff]  ;;  %v973_v61 = vld [vmem:[%s2983_s3 + $0xc0] sm:$0xff] }
  0xb7   :  { %1492 = vmatprep.subr.bf16.mxu0 %v1491_v46  ;;  %v433_v46 = vld [vmem:[%s2981_s1 + $0xc78] sm:$0xff]  ;;  %v955_v59 = vld [vmem:[%s2983_s3 + $0x30] sm:$0xff]  ;;  %v974_v63 = vld [vmem:[%s2983_s3 + $0xc8] sm:$0xff] }
  0xb8   :  { %v1515_v48 = vpack.c.bf16 %v433_v46, %v431_v45  ;;  %v956_v60 = vld [vmem:[%s2983_s3 + $0x38] sm:$0xff]  ;;  %v975_v3 = vld [vmem:[%s2983_s3 + $0xd0] sm:$0xff]  ;;  %v977_v9 = vld [vmem:[%s2983_s3 + $0xe0] sm:$0xff] }
  0xb9   :  { %1302 = vmatpush1.bf16.msra.mxu1 %v1301_v52  ;;  %v33_v52 = vld [vmem:[%s2980_s0 + $0x60] sm:$0xff]  ;;  %v1533_v62 = vpack.c.bf16 %v956_v60, %v955_v59  ;;  %v976_v4 = vld [vmem:[%s2983_s3 + $0xd8] sm:$0xff]  ;;  %v959_v7 = vld [vmem:[%s2983_s3 + $0x50] sm:$0xff] }
  0xba   :  { %1494 = vmatpush1.bf16.msra.mxu0 %v1493_v53  ;;  %1304 = vmatprep.subr.bf16.mxu1 %v1303_v54  ;;  %v953_v53 = vld [vmem:[%s2983_s3 + $0x20] sm:$0xff]  ;;  %v954_v54 = vld [vmem:[%s2983_s3 + $0x28] sm:$0xff]  ;;  %v960_v8 = vld [vmem:[%s2983_s3 + $0x58] sm:$0xff] }
  0xbb   :  { %1496 = vmatprep.subr.bf16.mxu0 %v1495_v58  ;;  %v1529_v55 = vpack.c.bf16 %v954_v54, %v953_v53  ;;  %v1531_v58 = vpack.c.bf16 %v972_v57, %v971_v56  ;;  %v978_v10 = vld [vmem:[%s2983_s3 + $0xe8] sm:$0xff]  ;;  %v1541_v11 = vpack.c.bf16 %v960_v8, %v959_v7  ;;  %v979_v16 = vld [vmem:[%s2983_s3 + $0xf0] sm:$0xff]  ;;  %v964_v20 = vld [vmem:[%s2983_s3 + $0x78] sm:$0xff] }
  0xbc   :  { %v963_v19 = vld [vmem:[%s2983_s3 + $0x70] sm:$0xff] }
  0xbd   :  { %1306 = vmatpush1.bf16.msra.mxu1 %v1305_v0  ;;  %v957_v0 = vld [vmem:[%s2983_s3 + $0x40] sm:$0xff]  ;;  %v1549_v21 = vpack.c.bf16 %v964_v20, %v963_v19 }
  0xbe   :  { %1498 = vmatpush1.bf16.msra.mxu0 %v1497_v1  ;;  %1308 = vmatprep.subr.bf16.mxu1 %v1307_v2  ;;  %v958_v1 = vld [vmem:[%s2983_s3 + $0x48] sm:$0xff]  ;;  %v1535_v2 = vpack.c.bf16 %v974_v63, %v973_v61 }
  0xbf   :  { %1500 = vmatprep.subr.bf16.mxu0 %v1499_v6  ;;  %v1537_v5 = vpack.c.bf16 %v958_v1, %v957_v0  ;;  %v1539_v6 = vpack.c.bf16 %v976_v4, %v975_v3 }
  0xc1   :  { %1310 = vmatpush1.bf16.msra.mxu1 %v1309_v12  ;;  %v1543_v12 = vpack.c.bf16 %v978_v10, %v977_v9 }
  0xc2   :  { %1502 = vmatpush1.bf16.msra.mxu0 %v1501_v13  ;;  %1520 = vmatprep.subr.bf16.mxu1 %v1519_v14  ;;  %v961_v13 = vld [vmem:[%s2983_s3 + $0x60] sm:$0xff]  ;;  %v962_v14 = vld [vmem:[%s2983_s3 + $0x68] sm:$0xff] }
  0xc3   :  { %1504 = vmatprep.subr.bf16.mxu0 %v1503_v17  ;;  %v1545_v15 = vpack.c.bf16 %v962_v14, %v961_v13  ;;  %v980_v17 = vld [vmem:[%s2983_s3 + $0xf8] sm:$0xff] }
  0xc4   :  { %657 = vmatmul.mubr.f32.vlgmr.msra.gmra.mrb[0].mxu1 %v25_v24  ;;  %v1547_v18 = vpack.c.bf16 %v980_v17, %v979_v16 }
  0xc5   :  { %870 = vmatmul.mubr.f32.vlgmr.msra.gmra.mrb[0].mxu0 %v31_v25  ;;  %1522 = vmatpush3.bf16.msra.mxu1 %v1521_v26  ;;  %v437_v25 = vshrl.u32 %v436_v22, 7 }
  0xc6   :  { %1506 = vmatpush1.bf16.msra.mxu0 %v1505_v27  ;;  %940 = vmatprep.mubr.f32.mxu0 %v1595_v40  ;;  %v434_v27 = vld [vmem:[%s2982_s2] sm:$0x3]  ;;  %s1596_s2 = smov [#allocation2]  }
  0xc7   :  { %1508 = vmatprep.subr.bf16.mxu0 %v1507_v31  ;;  %1524 = vmatprep.subr.bf16.mxu1 %v1523_v33  ;;  %v438_v26 = vsub.s32 0, %v437_v25  ;;  %v442_v28 = vsub.s32 1, %v437_v25  ;;  %s1074_s7 = sshll.u32 %s1596_s2, 4  ;;  %s1075_s7 = int_to_ptr.vmem [resolvable:$true] %s1074_s7 }
  0xc8   :  { %s1571_s8 = scalar_lea.vmem %s1075_s7, 128  ;;  %p1576_p1 = scmp.lt.s32.totalorder %s1075_s7, %s1075_s7 }
  0xc9   :  { %1526 = vmatpush3.bf16.msra.mxu1 %v1525_v38  ;;  %v439_v29 = vrot.slane %v434_v27, %v438_v26  ;;  %v443_v30 = vrot.slane %v434_v27, %v442_v28  ;;  %p1572_p0 = scmp.ne.s32.totalorder %s1075_s7, %s1571_s8  ;;  %p1577_p2 = scmp.lt.s32.totalorder %s1571_s8, %s1571_s8 }
  0xca   :  { %1510 = vmatpush1.bf16.msra.mxu0 %v1509_v39  ;;  %1528 = vmatprep.subr.bf16.mxu1 %v1527_v41  ;;  %v1083_v41 = vld [vmem:[%s2984_s4] ss:$0 sm:$0xff] }
  0xcb   :  { %1512 = vmatprep.subr.bf16.mxu0 %v1511_v42  ;;  %p1578_p3 = por %p1577_p2, %p1576_p1 }
  0xcd   :  { %1530 = vmatpush3.bf16.msra.mxu1 %v1529_v55  ;;  %p1579_p4 = pnand %p1578_p3, %p1572_p0 }
  0xce   :  { %1514 = vmatpush1.bf16.msra.mxu0 %v1513_v47  ;;  %1532 = vmatprep.subr.bf16.mxu1 %v1531_v58 }
  0xcf   :  { %1516 = vmatprep.subr.bf16.mxu0 %v1515_v48 }
  0xd1   :  { %1534 = vmatpush3.bf16.msra.mxu1 %v1533_v62 }
  0xd2   :  { %1518 = vmatpush1.bf16.msra.mxu0 %v1517_v51  ;;  %1536 = vmatprep.subr.bf16.mxu1 %v1535_v2 }
  0xd5   :  { %1082 = vmatmul.mubr.msk.f32.vlgmr.msra.gmra.mrb[0].mxu0 %vm446_vm0, %v33_v52  ;;  %1538 = vmatpush3.bf16.msra.mxu1 %v1537_v5 }
  0xd6   :  { %1540 = vmatprep.subr.bf16.mxu1 %v1539_v6 }
  0xd9   :  { %1542 = vmatpush3.bf16.msra.mxu1 %v1541_v11 }
  0xda   :  { %1544 = vmatprep.subr.bf16.mxu1 %v1543_v12 }
  0xdd   :  { %1546 = vmatpush3.bf16.msra.mxu1 %v1545_v15 }
  0xde   :  { %1548 = vmatprep.subr.bf16.mxu1 %v1547_v18 }
  0xe1   :  { %1550 = vmatpush3.bf16.msra.mxu1 %v1549_v21 }
 0x197   :  { %v658_v23 = vpop.f32.mrb[0].mxu1 }
 0x198   :  { %v660_v24 = vpop.f32.mrb[1].mxu1  ;;  %v1551_v31 = vadd.f32 %v658_v23, %v439_v29 }
 0x199   :  { %v1553_v32 = vadd.f32 %v660_v24, %v443_v30 }
 0x1a8   :  { %v942_v33 = vpop.f32.mrb[0].mxu0 }
 0x1a9   :  { %v1552_v34 = vadd.f32 %v1551_v31, %v942_v33  ;;  %v944_v35 = vpop.f32.mrb[1].mxu0 }
 0x1aa   :  { %v1554_v36 = vadd.f32 %v1553_v32, %v944_v35 }
 0x1ab   :  { %v947_v38 = vmax.f32 %v1552_v34, 0.0 }
 0x1ac   :  { %v948_v37 = vmax.f32 %v1554_v36, 0.0 }
 0x1ae   :  { %1052 = vmatprep.mubr.f32.mxu1 %v948_v37 }
 0x1af   :  { %1053 = vmatmul.mubr.f32.vlgmr.msra.gmra.mrb[2].mxu1 %v947_v38 }
 0x282   :  { %v1116_v39 = vpop.f32.mrb[2].mxu1 }
 0x283   :  { %v1117_v40 = vpop.f32.mrb[3].mxu1 }
 0x284   :  { %v1118_v42 = vadd.f32 %v1117_v40, %v1116_v39 }
 0x286   :  { %v1055_v43 = vadd.f32 %v1118_v42, %v1083_v41 }
 0x288   :  { %1058 = vmax.xlane.f32.xlu0 %v1055_v43 }
 0x315   :  { %v1059_v44 = vpop.xlane.xlu0 %1058 }
 0x316   :  { %v1060_v45 = vsub.f32 %v1055_v43, %v1059_v44 }
 0x318   :  { %v1061_v46 = vmul.f32 1.442695, %v1060_v45 }
 0x31a   :  { %1567 = vpow2.f32 %v1061_v46 }
 0x324   :  { %v1568_v47 = vpop.eup %1567 }
 0x325   :  { %1063 = vadd.xlane.f32.xlu0 %v1568_v47 }
 0x3b2   :  { %v1064_v48 = vpop.xlane.xlu0 %1063 }
 0x3b3   :  { %1569 = vrcp.f32 %v1064_v48 }
 0x3bd   :  { %v1570_v49 = vpop.eup %1569 }
 0x3be   :  { %v1066_v50 = vmul.f32 %v1570_v49, %v1568_v47 }
 0x3c0   :  { %1067 = vst [vmem:[#allocation2] sm:$0xff] %v1066_v50 }
 0x3c1   :  { %1582 = shalt.err (!%p1579_p4)
}
 0x3c2   :  { %s1583_s10 = scalar_lea.hbm %s2985_s5, 128 }
 0x3c3   :  { %p1584_p5 = scmp.ne.s32.totalorder %s2985_s5, %s1583_s10  ;;  %p1587_p6 = scmp.lt.u32.totalorder %s1583_s10, %s2985_s5 }
 0x3c5   :  { %p1589_p7 = pnand %p1587_p6, %p1584_p5 }
 0x3c7   :  { %1592 = shalt.err (!%p1589_p7)
}
 0x3c8   :  { %1077 = dma.vmem_to_hbm [thread:$0]  %s1075_s7, 128, %s2985_s5, [#allocation3]  }
 0x3c9   :  { %1593 = dma.done.wait [#allocation3], 128  }
 0x3ca   :  { %1594 = vsyncadd [#allocation3], 4294967168 }
 0x3cb   :  { %1081 = vsyncpa [#allocation3], 1 }

</bundles_post_ra>
